<compile_context>
chip_gen: v5e
topology: v5e:2x2
jax: 0.10.0
libtpu: 0.0.40
codegen_flags: <defaults>
</compile_context>

<pallas_src>
import functools

import jax
import jax.numpy as jnp
from jax import lax
from jax.experimental import pallas as pl
from jax.experimental.pallas import tpu as pltpu

KH = 4  # conv kernel height, kernel_size=(4, 1)

# Flip to True on v6e/v7x if profiling shows the kernel EUP(tanh)-bound:
# bf16 tanh runs ~2x faster there, at ~0.4% relative error before the H-sum
# (re-validate the comparison tolerance if enabled; keep False on v5e).
_TANH_IN_BF16 = False


def fused_conv_bn_tanh_kernel(x_hbm, wt_ref, g_ref, b_ref, o_ref, x_vmem, y_ref,
                              *, w_dim, h_out, chunk_h):
    # x_hbm : (N, H*W, C_in) bf16 in HBM     wt_ref: (KH, C_in, Ct) bf16 in VMEM
    # g_ref : (1, Ct) f32                    b_ref : (1, Ct) f32
    # o_ref : (N, W, Ct) f32                 x_vmem: (N, H*W, C_in) bf16 scratch
    # y_ref : (N, W, Ct) f32 scratch holding the H-reduced activations
    n = x_vmem.shape[0]
    ct = wt_ref.shape[2]

    # Single-buffered input: one DMA of the whole (grid-invariant) x slab per
    # grid step.  Done unconditionally (not @pl.when(j == 0)) so it stays
    # correct if the "parallel" grid axis is sharded across TensorCores; with a
    # grid of 1-2 steps the one possibly-redundant ~MiB copy is noise.
    pltpu.sync_copy(x_hbm, x_vmem)

    num_full = h_out // chunk_h
    rem = h_out - num_full * chunk_h

    def conv_tanh_hsum(b, h0, rows):
        """KH conv taps as MXU matmuls + tanh + partial sum over `rows` conv-H rows."""
        m = rows * w_dim
        acc = jnp.zeros((m, ct), jnp.float32)
        for kh in range(KH):              # 4 accumulated MXU matmuls, f32 accum
            start = (h0 + kh) * w_dim
            if not isinstance(start, int):
                start = pl.multiple_of(start, 8)   # W % 8 == 0 -> 8-aligned slice
            lhs = x_vmem[b, pl.ds(start, m), :]    # (m, C_in) bf16
            acc = acc + jnp.dot(lhs, wt_ref[kh],
                                preferred_element_type=jnp.float32)
        if _TANH_IN_BF16:
            t = jnp.tanh(acc.astype(jnp.bfloat16)).astype(jnp.float32)
        else:
            t = jnp.tanh(acc)
        # layout-preserving sublane split, then reduce conv-H (major axis)
        return jnp.sum(t.reshape(rows, w_dim, ct), axis=0)      # (W, Ct)

    # ---- Conv(kernel=(4,1), VALID) + tanh + sum over conv-H, chunked over M ----
    for b in range(n):                     # N is tiny (1 in the original model)
        def chunk_body(i, wsum):
            return wsum + conv_tanh_hsum(b, i * chunk_h, chunk_h)

        wsum = lax.fori_loop(0, num_full, chunk_body,
                             jnp.zeros((w_dim, ct), jnp.float32),
                             unroll=True)
        if rem:                            # static remainder chunk (h_out may be prime)
            wsum = wsum + conv_tanh_hsum(b, num_full * chunk_h, rem)
        y_ref[b] = wsum

    # ---- BatchNorm1d (training-mode batch stats over (N, W) per channel) + tanh ----
    # Two-pass variance on the VMEM-resident scratch; o_ref written exactly once.
    y = y_ref[...]                                        # (N, W, Ct)
    inv_cnt = 1.0 / float(n * w_dim)
    mean = jnp.sum(jnp.sum(y, axis=1, keepdims=True), axis=0, keepdims=True) * inv_cnt
    d = y - mean
    var = jnp.sum(jnp.sum(d * d, axis=1, keepdims=True), axis=0, keepdims=True) * inv_cnt
    scale = lax.rsqrt(var + 1e-5) * g_ref[...].reshape(1, 1, ct)
    o_ref[...] = jnp.tanh(d * scale + b_ref[...].reshape(1, 1, ct))


def _pick_cout_tile(c_out_padded):
    """Per-generation C_out tile: 256 on v6e (one TC, 256-wide MXU), else 128."""
    kind = ""
    try:
        kind = jax.devices()[0].device_kind.lower()
    except Exception:
        pass
    if ("v6" in kind) and (c_out_padded % 256 == 0):
        return 256
    if c_out_padded % 128 == 0:
        return 128
    return c_out_padded


def model_tanh_forward(x, conv_w, gamma, beta):
    n, c_in, h, w_dim = x.shape
    c_out = conv_w.shape[0]
    h_out = h - KH + 1
    # TODO(synk): W not a multiple of 8 would need masked padding of the W axis
    # (padding changes BN batch statistics); unsupported here.
    assert w_dim % 8 == 0, "W must be a multiple of 8 (sublane tile)"

    # Lane-dense padding of the channel dims (numerically neutral: zero weights
    # / zero gamma-beta on padded channels; padded outputs sliced off below).
    c_in_p = ((c_in + 127) // 128) * 128
    c_out_p = ((c_out + 127) // 128) * 128

    # glue (plain JAX): NCHW -> (N, H*W, C_in) bf16 (C_in on lanes).
    x_flat = jnp.transpose(x, (0, 2, 3, 1)).reshape(n, h * w_dim, c_in)
    x_flat = x_flat.astype(jnp.bfloat16)
    if c_in_p != c_in:
        x_flat = jnp.pad(x_flat, ((0, 0), (0, 0), (0, c_in_p - c_in)))

    # conv weight (C_out, C_in, KH, 1) -> (KH, C_in, C_out) bf16 (C_out on lanes).
    wt = jnp.transpose(conv_w[:, :, :, 0], (2, 1, 0)).astype(jnp.bfloat16)
    wt = jnp.pad(wt, ((0, 0), (0, c_in_p - c_in), (0, c_out_p - c_out)))
    g2 = jnp.pad(gamma.astype(jnp.float32), (0, c_out_p - c_out)).reshape(1, c_out_p)
    b2 = jnp.pad(beta.astype(jnp.float32), (0, c_out_p - c_out)).reshape(1, c_out_p)

    cout_tile = _pick_cout_tile(c_out_p)
    num_tiles = c_out_p // cout_tile

    # M-chunk of ~512-1024 rows so MXU / EUP / VPU phases overlap per chunk.
    chunk_h = max(1, min(h_out, max(8, 512 // w_dim)))

    kernel = functools.partial(fused_conv_bn_tanh_kernel,
                               w_dim=w_dim, h_out=h_out, chunk_h=chunk_h)

    out_t = pl.pallas_call(
        kernel,
        out_shape=jax.ShapeDtypeStruct((n, w_dim, c_out_p), jnp.float32),
        grid_spec=pltpu.PrefetchScalarGridSpec(
            num_scalar_prefetch=0,
            grid=(num_tiles,),
            in_specs=[
                pl.BlockSpec(memory_space=pl.ANY),                     # x stays in HBM
                pl.BlockSpec((KH, c_in_p, cout_tile), lambda j: (0, 0, j)),
                pl.BlockSpec((1, cout_tile), lambda j: (0, j)),
                pl.BlockSpec((1, cout_tile), lambda j: (0, j)),
            ],
            out_specs=pl.BlockSpec((n, w_dim, cout_tile), lambda j: (0, 0, j)),
            scratch_shapes=[
                pltpu.VMEM((n, h * w_dim, c_in_p), jnp.bfloat16),      # single-buffered x
                pltpu.VMEM((n, w_dim, cout_tile), jnp.float32),        # H-reduced activations
            ],
        ),
        compiler_params=pltpu.CompilerParams(
            dimension_semantics=("parallel",),
            vmem_limit_bytes=32 * 1024 * 1024,
        ),
    )(x_flat, wt, g2, b2)

    # drop padded channels; back to the PyTorch output layout (N, C_out, W)
    return jnp.transpose(out_t[:, :, :c_out], (0, 2, 1))


if __name__ == "__main__":
    key = jax.random.PRNGKey(0)
    kx, kw = jax.random.split(key, 2)

    # small shapes consistent with the module (original: N=1, C_in=128,
    # C_out=256, H=W=64); scaled down here — also exercises the 128-lane
    # channel-padding path.
    N, C_IN, C_OUT, H, W = 2, 32, 64, 16, 16

    # faithful to the original input construction: randn(N,C,H,1) repeated along W
    x = jnp.tile(jax.random.normal(kx, (N, C_IN, H, 1), jnp.float32), (1, 1, 1, W))

    # Conv2d weight (C_out, C_in, 4, 1), deterministic kaiming-uniform-style init
    fan_in = C_IN * KH * 1
    bound = 1.0 / (fan_in ** 0.5)
    conv_w = jax.random.uniform(kw, (C_OUT, C_IN, KH, 1), jnp.float32, -bound, bound)

    # TODO(synk): the original module declares BatchNorm1d(num_features=9216),
    # which mismatches x1's channel dim and would raise in PyTorch; BN params
    # here are sized to C_OUT (defaults gamma=1, beta=0) so the forward runs.
    gamma = jnp.ones((C_OUT,), jnp.float32)
    beta = jnp.zeros((C_OUT,), jnp.float32)

    out = jax.block_until_ready(model_tanh_forward(x, conv_w, gamma, beta))

    # plain-JAX reference.  Conv inputs are rounded to bf16 to match the kernel's
    # bf16 MXU operands (accumulation stays f32 in both paths).
    xb = x.astype(jnp.bfloat16).astype(jnp.float32)
    wb = conv_w.astype(jnp.bfloat16).astype(jnp.float32)
    conv = lax.conv_general_dilated(
        xb, wb, window_strides=(1, 1), padding="VALID",
        dimension_numbers=("NCHW", "OIHW", "NCHW"))
    y_ref = jnp.sum(jnp.tanh(conv), axis=2)
    mean = jnp.mean(y_ref, axis=(0, 2), keepdims=True)
    var = jnp.mean((y_ref - mean) ** 2, axis=(0, 2), keepdims=True)
    ref = jnp.tanh((y_ref - mean) * lax.rsqrt(var + 1e-5)
                   * gamma[None, :, None] + beta[None, :, None])

    assert out.shape == (N, C_OUT, W), out.shape
    err = float(jnp.max(jnp.abs(out - ref)))
    assert jnp.allclose(out, ref, atol=2e-3, rtol=2e-3), err
    print("KERNEL_OK")
</pallas_src>

<mosaic_0001>
module attributes {stable_mosaic.version = 11 : i64} {
  func.func @fused_conv_bn_tanh_kernel(%arg0: i32, %arg1: memref<2x256x128xbf16, #tpu.memory_space<any>>, %arg2: memref<4x128x128xbf16, #tpu.memory_space<vmem>>, %arg3: memref<1x128xf32, #tpu.memory_space<vmem>>, %arg4: memref<1x128xf32, #tpu.memory_space<vmem>>, %arg5: memref<2x16x128xf32, #tpu.memory_space<vmem>>, %arg6: memref<2x256x128xbf16, #tpu.memory_space<vmem>>, %arg7: memref<2x16x128xf32, #tpu.memory_space<vmem>>) attributes {dimension_semantics = [#tpu.dimension_semantics<parallel>], iteration_bounds = array<i64: 1>, scalar_prefetch = 0 : i64, scratch_operands = 2 : i64, tpu.core_type = #tpu.core_type<tc>, window_params = [{}, {transform_indices = @transform_1, window_bounds = array<i64: 4, 128, 128>}, {transform_indices = @transform_2, window_bounds = array<i64: 1, 128>}, {transform_indices = @transform_3, window_bounds = array<i64: 1, 128>}, {transform_indices = @transform_4, window_bounds = array<i64: 2, 16, 128>}]} {
    "tpu.region"() ({
      %130 = tpu.sem_alloc : memref<!tpu.dma_semaphore, #tpu.memory_space<semaphore_mem>>
      tpu.enqueue_dma source(%arg1 : memref<2x256x128xbf16, #tpu.memory_space<any>>) target(%arg6 : memref<2x256x128xbf16, #tpu.memory_space<vmem>>) target_semaphore(%130 : memref<!tpu.dma_semaphore, #tpu.memory_space<semaphore_mem>>)
      tpu.wait_dma2 semaphore(%130 : memref<!tpu.dma_semaphore, #tpu.memory_space<semaphore_mem>>) src(%arg1 : memref<2x256x128xbf16, #tpu.memory_space<any>>) dst(%arg6 : memref<2x256x128xbf16, #tpu.memory_space<vmem>>)
      tpu.yield
    }) : () -> ()
    %cst = arith.constant 0.000000e+00 : f32
    %0 = vector.broadcast %cst : f32 to vector<16x128xf32>
    %c0_i32 = arith.constant 0 : i32
    %c13_i32 = arith.constant 13 : i32
    %1 = arith.muli %c0_i32, %c13_i32 : i32
    %cst_0 = arith.constant 0.000000e+00 : f32
    %2 = vector.broadcast %cst_0 : f32 to vector<208x128xf32>
    %c0_i32_1 = arith.constant 0 : i32
    %3 = arith.addi %1, %c0_i32_1 : i32
    %c16_i32 = arith.constant 16 : i32
    %4 = arith.muli %3, %c16_i32 : i32
    %5 = tpu.assume_multiple %4, 8 : i32
    %c0 = arith.constant 0 : index
    %6 = arith.index_cast %5 : i32 to index
    %c0_2 = arith.constant 0 : index
    %7 = vector.load %arg6[%c0, %6, %c0_2] : memref<2x256x128xbf16, #tpu.memory_space<vmem>>, vector<1x208x128xbf16>
    %8 = vector.shape_cast %7 : vector<1x208x128xbf16> to vector<208x128xbf16>
    %c0_3 = arith.constant 0 : index
    %c0_4 = arith.constant 0 : index
    %c0_5 = arith.constant 0 : index
    %9 = vector.load %arg2[%c0_3, %c0_4, %c0_5] : memref<4x128x128xbf16, #tpu.memory_space<vmem>>, vector<1x128x128xbf16>
    %10 = vector.shape_cast %9 : vector<1x128x128xbf16> to vector<128x128xbf16>
    %cst_6 = arith.constant dense<0.000000e+00> : vector<208x128xf32>
    %11 = tpu.matmul %8, %10, %cst_6 {dimension_numbers = #tpu.dot_dimension_numbers<[1], [0], [0], [1], [0, 0, 1, 1], [], []>} : vector<208x128xbf16>, vector<128x128xbf16>, vector<208x128xf32> -> vector<208x128xf32>
    %12 = arith.addf %2, %11 : vector<208x128xf32>
    %c1_i32 = arith.constant 1 : i32
    %13 = arith.addi %1, %c1_i32 : i32
    %c16_i32_7 = arith.constant 16 : i32
    %14 = arith.muli %13, %c16_i32_7 : i32
    %15 = tpu.assume_multiple %14, 8 : i32
    %c0_8 = arith.constant 0 : index
    %16 = arith.index_cast %15 : i32 to index
    %c0_9 = arith.constant 0 : index
    %17 = vector.load %arg6[%c0_8, %16, %c0_9] : memref<2x256x128xbf16, #tpu.memory_space<vmem>>, vector<1x208x128xbf16>
    %18 = vector.shape_cast %17 : vector<1x208x128xbf16> to vector<208x128xbf16>
    %c1 = arith.constant 1 : index
    %c0_10 = arith.constant 0 : index
    %c0_11 = arith.constant 0 : index
    %19 = vector.load %arg2[%c1, %c0_10, %c0_11] : memref<4x128x128xbf16, #tpu.memory_space<vmem>>, vector<1x128x128xbf16>
    %20 = vector.shape_cast %19 : vector<1x128x128xbf16> to vector<128x128xbf16>
    %cst_12 = arith.constant dense<0.000000e+00> : vector<208x128xf32>
    %21 = tpu.matmul %18, %20, %cst_12 {dimension_numbers = #tpu.dot_dimension_numbers<[1], [0], [0], [1], [0, 0, 1, 1], [], []>} : vector<208x128xbf16>, vector<128x128xbf16>, vector<208x128xf32> -> vector<208x128xf32>
    %22 = arith.addf %12, %21 : vector<208x128xf32>
    %c2_i32 = arith.constant 2 : i32
    %23 = arith.addi %1, %c2_i32 : i32
    %c16_i32_13 = arith.constant 16 : i32
    %24 = arith.muli %23, %c16_i32_13 : i32
    %25 = tpu.assume_multiple %24, 8 : i32
    %c0_14 = arith.constant 0 : index
    %26 = arith.index_cast %25 : i32 to index
    %c0_15 = arith.constant 0 : index
    %27 = vector.load %arg6[%c0_14, %26, %c0_15] : memref<2x256x128xbf16, #tpu.memory_space<vmem>>, vector<1x208x128xbf16>
    %28 = vector.shape_cast %27 : vector<1x208x128xbf16> to vector<208x128xbf16>
    %c2 = arith.constant 2 : index
    %c0_16 = arith.constant 0 : index
    %c0_17 = arith.constant 0 : index
    %29 = vector.load %arg2[%c2, %c0_16, %c0_17] : memref<4x128x128xbf16, #tpu.memory_space<vmem>>, vector<1x128x128xbf16>
    %30 = vector.shape_cast %29 : vector<1x128x128xbf16> to vector<128x128xbf16>
    %cst_18 = arith.constant dense<0.000000e+00> : vector<208x128xf32>
    %31 = tpu.matmul %28, %30, %cst_18 {dimension_numbers = #tpu.dot_dimension_numbers<[1], [0], [0], [1], [0, 0, 1, 1], [], []>} : vector<208x128xbf16>, vector<128x128xbf16>, vector<208x128xf32> -> vector<208x128xf32>
    %32 = arith.addf %22, %31 : vector<208x128xf32>
    %c3_i32 = arith.constant 3 : i32
    %33 = arith.addi %1, %c3_i32 : i32
    %c16_i32_19 = arith.constant 16 : i32
    %34 = arith.muli %33, %c16_i32_19 : i32
    %35 = tpu.assume_multiple %34, 8 : i32
    %c0_20 = arith.constant 0 : index
    %36 = arith.index_cast %35 : i32 to index
    %c0_21 = arith.constant 0 : index
    %37 = vector.load %arg6[%c0_20, %36, %c0_21] : memref<2x256x128xbf16, #tpu.memory_space<vmem>>, vector<1x208x128xbf16>
    %38 = vector.shape_cast %37 : vector<1x208x128xbf16> to vector<208x128xbf16>
    %c3 = arith.constant 3 : index
    %c0_22 = arith.constant 0 : index
    %c0_23 = arith.constant 0 : index
    %39 = vector.load %arg2[%c3, %c0_22, %c0_23] : memref<4x128x128xbf16, #tpu.memory_space<vmem>>, vector<1x128x128xbf16>
    %40 = vector.shape_cast %39 : vector<1x128x128xbf16> to vector<128x128xbf16>
    %cst_24 = arith.constant dense<0.000000e+00> : vector<208x128xf32>
    %41 = tpu.matmul %38, %40, %cst_24 {dimension_numbers = #tpu.dot_dimension_numbers<[1], [0], [0], [1], [0, 0, 1, 1], [], []>} : vector<208x128xbf16>, vector<128x128xbf16>, vector<208x128xf32> -> vector<208x128xf32>
    %42 = arith.addf %32, %41 : vector<208x128xf32>
    %43 = math.tanh %42 : vector<208x128xf32>
    %44 = vector.shape_cast %43 : vector<208x128xf32> to vector<13x16x128xf32>
    %cst_25 = arith.constant dense<0.000000e+00> : vector<16x128xf32>
    %45 = vector.multi_reduction <add>, %44, %cst_25 [0] : vector<13x16x128xf32> to vector<16x128xf32>
    %46 = arith.addf %0, %45 : vector<16x128xf32>
    %c1_i32_26 = arith.constant 1 : i32
    %c0_27 = arith.constant 0 : index
    %c0_28 = arith.constant 0 : index
    %c0_29 = arith.constant 0 : index
    %47 = vector.load %arg7[%c0_27, %c0_28, %c0_29] : memref<2x16x128xf32, #tpu.memory_space<vmem>>, vector<1x16x128xf32>
    %48 = vector.shape_cast %47 : vector<1x16x128xf32> to vector<16x128xf32>
    %49 = vector.shape_cast %46 : vector<16x128xf32> to vector<1x16x128xf32>
    tpu.vector_store %arg7[%c0_27, %c0_28, %c0_29], %49 {strides = array<i32>} : memref<2x16x128xf32, #tpu.memory_space<vmem>>, vector<1x16x128xf32>,
    %cst_30 = arith.constant 0.000000e+00 : f32
    %50 = vector.broadcast %cst_30 : f32 to vector<16x128xf32>
    %c0_i32_31 = arith.constant 0 : i32
    %c13_i32_32 = arith.constant 13 : i32
    %51 = arith.muli %c0_i32_31, %c13_i32_32 : i32
    %cst_33 = arith.constant 0.000000e+00 : f32
    %52 = vector.broadcast %cst_33 : f32 to vector<208x128xf32>
    %c0_i32_34 = arith.constant 0 : i32
    %53 = arith.addi %51, %c0_i32_34 : i32
    %c16_i32_35 = arith.constant 16 : i32
    %54 = arith.muli %53, %c16_i32_35 : i32
    %55 = tpu.assume_multiple %54, 8 : i32
    %c1_36 = arith.constant 1 : index
    %56 = arith.index_cast %55 : i32 to index
    %c0_37 = arith.constant 0 : index
    %57 = vector.load %arg6[%c1_36, %56, %c0_37] : memref<2x256x128xbf16, #tpu.memory_space<vmem>>, vector<1x208x128xbf16>
    %58 = vector.shape_cast %57 : vector<1x208x128xbf16> to vector<208x128xbf16>
    %c0_38 = arith.constant 0 : index
    %c0_39 = arith.constant 0 : index
    %c0_40 = arith.constant 0 : index
    %59 = vector.load %arg2[%c0_38, %c0_39, %c0_40] : memref<4x128x128xbf16, #tpu.memory_space<vmem>>, vector<1x128x128xbf16>
    %60 = vector.shape_cast %59 : vector<1x128x128xbf16> to vector<128x128xbf16>
    %cst_41 = arith.constant dense<0.000000e+00> : vector<208x128xf32>
    %61 = tpu.matmul %58, %60, %cst_41 {dimension_numbers = #tpu.dot_dimension_numbers<[1], [0], [0], [1], [0, 0, 1, 1], [], []>} : vector<208x128xbf16>, vector<128x128xbf16>, vector<208x128xf32> -> vector<208x128xf32>
    %62 = arith.addf %52, %61 : vector<208x128xf32>
    %c1_i32_42 = arith.constant 1 : i32
    %63 = arith.addi %51, %c1_i32_42 : i32
    %c16_i32_43 = arith.constant 16 : i32
    %64 = arith.muli %63, %c16_i32_43 : i32
    %65 = tpu.assume_multiple %64, 8 : i32
    %c1_44 = arith.constant 1 : index
    %66 = arith.index_cast %65 : i32 to index
    %c0_45 = arith.constant 0 : index
    %67 = vector.load %arg6[%c1_44, %66, %c0_45] : memref<2x256x128xbf16, #tpu.memory_space<vmem>>, vector<1x208x128xbf16>
    %68 = vector.shape_cast %67 : vector<1x208x128xbf16> to vector<208x128xbf16>
    %c1_46 = arith.constant 1 : index
    %c0_47 = arith.constant 0 : index
    %c0_48 = arith.constant 0 : index
    %69 = vector.load %arg2[%c1_46, %c0_47, %c0_48] : memref<4x128x128xbf16, #tpu.memory_space<vmem>>, vector<1x128x128xbf16>
    %70 = vector.shape_cast %69 : vector<1x128x128xbf16> to vector<128x128xbf16>
    %cst_49 = arith.constant dense<0.000000e+00> : vector<208x128xf32>
    %71 = tpu.matmul %68, %70, %cst_49 {dimension_numbers = #tpu.dot_dimension_numbers<[1], [0], [0], [1], [0, 0, 1, 1], [], []>} : vector<208x128xbf16>, vector<128x128xbf16>, vector<208x128xf32> -> vector<208x128xf32>
    %72 = arith.addf %62, %71 : vector<208x128xf32>
    %c2_i32_50 = arith.constant 2 : i32
    %73 = arith.addi %51, %c2_i32_50 : i32
    %c16_i32_51 = arith.constant 16 : i32
    %74 = arith.muli %73, %c16_i32_51 : i32
    %75 = tpu.assume_multiple %74, 8 : i32
    %c1_52 = arith.constant 1 : index
    %76 = arith.index_cast %75 : i32 to index
    %c0_53 = arith.constant 0 : index
    %77 = vector.load %arg6[%c1_52, %76, %c0_53] : memref<2x256x128xbf16, #tpu.memory_space<vmem>>, vector<1x208x128xbf16>
    %78 = vector.shape_cast %77 : vector<1x208x128xbf16> to vector<208x128xbf16>
    %c2_54 = arith.constant 2 : index
    %c0_55 = arith.constant 0 : index
    %c0_56 = arith.constant 0 : index
    %79 = vector.load %arg2[%c2_54, %c0_55, %c0_56] : memref<4x128x128xbf16, #tpu.memory_space<vmem>>, vector<1x128x128xbf16>
    %80 = vector.shape_cast %79 : vector<1x128x128xbf16> to vector<128x128xbf16>
    %cst_57 = arith.constant dense<0.000000e+00> : vector<208x128xf32>
    %81 = tpu.matmul %78, %80, %cst_57 {dimension_numbers = #tpu.dot_dimension_numbers<[1], [0], [0], [1], [0, 0, 1, 1], [], []>} : vector<208x128xbf16>, vector<128x128xbf16>, vector<208x128xf32> -> vector<208x128xf32>
    %82 = arith.addf %72, %81 : vector<208x128xf32>
    %c3_i32_58 = arith.constant 3 : i32
    %83 = arith.addi %51, %c3_i32_58 : i32
    %c16_i32_59 = arith.constant 16 : i32
    %84 = arith.muli %83, %c16_i32_59 : i32
    %85 = tpu.assume_multiple %84, 8 : i32
    %c1_60 = arith.constant 1 : index
    %86 = arith.index_cast %85 : i32 to index
    %c0_61 = arith.constant 0 : index
    %87 = vector.load %arg6[%c1_60, %86, %c0_61] : memref<2x256x128xbf16, #tpu.memory_space<vmem>>, vector<1x208x128xbf16>
    %88 = vector.shape_cast %87 : vector<1x208x128xbf16> to vector<208x128xbf16>
    %c3_62 = arith.constant 3 : index
    %c0_63 = arith.constant 0 : index
    %c0_64 = arith.constant 0 : index
    %89 = vector.load %arg2[%c3_62, %c0_63, %c0_64] : memref<4x128x128xbf16, #tpu.memory_space<vmem>>, vector<1x128x128xbf16>
    %90 = vector.shape_cast %89 : vector<1x128x128xbf16> to vector<128x128xbf16>
    %cst_65 = arith.constant dense<0.000000e+00> : vector<208x128xf32>
    %91 = tpu.matmul %88, %90, %cst_65 {dimension_numbers = #tpu.dot_dimension_numbers<[1], [0], [0], [1], [0, 0, 1, 1], [], []>} : vector<208x128xbf16>, vector<128x128xbf16>, vector<208x128xf32> -> vector<208x128xf32>
    %92 = arith.addf %82, %91 : vector<208x128xf32>
    %93 = math.tanh %92 : vector<208x128xf32>
    %94 = vector.shape_cast %93 : vector<208x128xf32> to vector<13x16x128xf32>
    %cst_66 = arith.constant dense<0.000000e+00> : vector<16x128xf32>
    %95 = vector.multi_reduction <add>, %94, %cst_66 [0] : vector<13x16x128xf32> to vector<16x128xf32>
    %96 = arith.addf %50, %95 : vector<16x128xf32>
    %c1_i32_67 = arith.constant 1 : i32
    %c1_68 = arith.constant 1 : index
    %c0_69 = arith.constant 0 : index
    %c0_70 = arith.constant 0 : index
    %97 = vector.load %arg7[%c1_68, %c0_69, %c0_70] : memref<2x16x128xf32, #tpu.memory_space<vmem>>, vector<1x16x128xf32>
    %98 = vector.shape_cast %97 : vector<1x16x128xf32> to vector<16x128xf32>
    %99 = vector.shape_cast %96 : vector<16x128xf32> to vector<1x16x128xf32>
    tpu.vector_store %arg7[%c1_68, %c0_69, %c0_70], %99 {strides = array<i32>} : memref<2x16x128xf32, #tpu.memory_space<vmem>>, vector<1x16x128xf32>,
    %c0_71 = arith.constant 0 : index
    %c0_72 = arith.constant 0 : index
    %c0_73 = arith.constant 0 : index
    %100 = vector.load %arg7[%c0_71, %c0_72, %c0_73] : memref<2x16x128xf32, #tpu.memory_space<vmem>>, vector<2x16x128xf32>
    %cst_74 = arith.constant dense<0.000000e+00> : vector<2x128xf32>
    %101 = vector.multi_reduction <add>, %100, %cst_74 [1] : vector<2x16x128xf32> to vector<2x128xf32>
    %102 = vector.shape_cast %101 : vector<2x128xf32> to vector<2x1x128xf32>
    %cst_75 = arith.constant dense<0.000000e+00> : vector<1x128xf32>
    %103 = vector.multi_reduction <add>, %102, %cst_75 [0] : vector<2x1x128xf32> to vector<1x128xf32>
    %104 = vector.shape_cast %103 : vector<1x128xf32> to vector<1x1x128xf32>
    %cst_76 = arith.constant 3.125000e-02 : f32
    %105 = vector.broadcast %cst_76 : f32 to vector<1x1x128xf32>
    %106 = arith.mulf %104, %105 : vector<1x1x128xf32>
    %107 = vector.broadcast %106 : vector<1x1x128xf32> to vector<2x16x128xf32>
    %108 = arith.subf %100, %107 : vector<2x16x128xf32>
    %109 = arith.mulf %108, %108 : vector<2x16x128xf32>
    %cst_77 = arith.constant dense<0.000000e+00> : vector<2x128xf32>
    %110 = vector.multi_reduction <add>, %109, %cst_77 [1] : vector<2x16x128xf32> to vector<2x128xf32>
    %111 = vector.shape_cast %110 : vector<2x128xf32> to vector<2x1x128xf32>
    %cst_78 = arith.constant dense<0.000000e+00> : vector<1x128xf32>
    %112 = vector.multi_reduction <add>, %111, %cst_78 [0] : vector<2x1x128xf32> to vector<1x128xf32>
    %113 = vector.shape_cast %112 : vector<1x128xf32> to vector<1x1x128xf32>
    %cst_79 = arith.constant 3.125000e-02 : f32
    %114 = vector.broadcast %cst_79 : f32 to vector<1x1x128xf32>
    %115 = arith.mulf %113, %114 : vector<1x1x128xf32>
    %cst_80 = arith.constant 9.99999974E-6 : f32
    %116 = vector.broadcast %cst_80 : f32 to vector<1x1x128xf32>
    %117 = arith.addf %115, %116 : vector<1x1x128xf32>
    %118 = math.rsqrt %117 : vector<1x1x128xf32>
    %c0_81 = arith.constant 0 : index
    %c0_82 = arith.constant 0 : index
    %119 = vector.load %arg3[%c0_81, %c0_82] : memref<1x128xf32, #tpu.memory_space<vmem>>, vector<1x128xf32>
    %120 = vector.shape_cast %119 : vector<1x128xf32> to vector<1x1x128xf32>
    %121 = arith.mulf %118, %120 : vector<1x1x128xf32>
    %122 = vector.broadcast %121 : vector<1x1x128xf32> to vector<2x16x128xf32>
    %123 = arith.mulf %108, %122 : vector<2x16x128xf32>
    %c0_83 = arith.constant 0 : index
    %c0_84 = arith.constant 0 : index
    %124 = vector.load %arg4[%c0_83, %c0_84] : memref<1x128xf32, #tpu.memory_space<vmem>>, vector<1x128xf32>
    %125 = vector.shape_cast %124 : vector<1x128xf32> to vector<1x1x128xf32>
    %126 = vector.broadcast %125 : vector<1x1x128xf32> to vector<2x16x128xf32>
    %127 = arith.addf %123, %126 : vector<2x16x128xf32>
    %128 = math.tanh %127 : vector<2x16x128xf32>
    %c0_85 = arith.constant 0 : index
    %c0_86 = arith.constant 0 : index
    %c0_87 = arith.constant 0 : index
    %129 = vector.load %arg5[%c0_85, %c0_86, %c0_87] : memref<2x16x128xf32, #tpu.memory_space<vmem>>, vector<2x16x128xf32>
    tpu.vector_store %arg5[%c0_85, %c0_86, %c0_87], %128 {strides = array<i32>} : memref<2x16x128xf32, #tpu.memory_space<vmem>>, vector<2x16x128xf32>,
    return
  }
  func.func @transform_1(%arg0: i32) -> (i32, i32, i32) {
    %c0_i32 = arith.constant 0 : i32
    %c0_i32_0 = arith.constant 0 : i32
    %c0_i32_1 = arith.constant 0 : i32
    return %c0_i32, %c0_i32_0, %arg0 : i32, i32, i32
  }
  func.func @transform_2(%arg0: i32) -> (i32, i32) {
    %c0_i32 = arith.constant 0 : i32
    %c0_i32_0 = arith.constant 0 : i32
    return %c0_i32, %arg0 : i32, i32
  }
  func.func @transform_3(%arg0: i32) -> (i32, i32) {
    %c0_i32 = arith.constant 0 : i32
    %c0_i32_0 = arith.constant 0 : i32
    return %c0_i32, %arg0 : i32, i32
  }
  func.func @transform_4(%arg0: i32) -> (i32, i32, i32) {
    %c0_i32 = arith.constant 0 : i32
    %c0_i32_0 = arith.constant 0 : i32
    %c0_i32_1 = arith.constant 0 : i32
    return %c0_i32, %c0_i32_0, %arg0 : i32, i32, i32
  }
}

</mosaic_0001>

<bundles_post_ra>
// kernel: tpu_custom_call.1
= control target key start
LH: loop header
LB: loop body
LE: loop exit
PB: predicated region body
PF: predicated region fallthrough
CT: control target
= control target key end

     0   :  { %9 = vsyncpa [#allocation5], 0  ;;  %s3423_s0 = inlined_call_operand.hbm [shape: bf16[2,256,128], index: 0, kind: input, shape index: {}]   ;;  %s3424_s1 = inlined_call_operand.hbm [shape: bf16[4,128,128], index: 1, kind: input, shape index: {}]   ;;  %s3425_s2 = inlined_call_operand.vmem [shape: f32[1,128], index: 2, kind: input, shape index: {}]   ;;  %s3426_s3 = inlined_call_operand.vmem [shape: f32[1,128], index: 3, kind: input, shape index: {}]   ;;  %s3427_s4 = inlined_call_operand.hbm [shape: f32[2,16,128], index: 4, kind: output, shape index: {}]  }
   0x1   :  { %10 = vsyncpa [#allocation6], 0  ;;  %s15_s17 = sshll.u32 %s3424_s1, 4  ;;  %s3358_s18 = smov [#allocation4]   ;;  %s16_s17 = int_to_ptr.hbm [resolvable:$true] %s15_s17 }
   0x2   :  { %s17_s19 = sshll.u32 %s3358_s18, 4  ;;  %s3359_s20 = smov 64   ;;  %s18_s19 = int_to_ptr.vmem [resolvable:$true] %s17_s19 }
   0x3   :  { %s3360_s21 = smov 4  }
   0x4   :  { %23 = dma.hbm_to_vmem [thread:$0]  %s16_s17, 4096, %s18_s19, [#allocation5], %s3359_s20, %s3359_s20, %s3360_s21  }
   0x5   :  { %3352 = dma.done.wait [#allocation5], 4096  }
   0x6   :  { %3353 = vsyncadd [#allocation5], 4294963200 }
   0x7   :  { %s39_s24 = sshll.u32 %s3423_s0, 4  ;;  %s3361_s25 = smov [#allocation2]   ;;  %s40_s24 = int_to_ptr.hbm [resolvable:$true] %s39_s24 }
   0x8   :  { %s41_s26 = sshll.u32 %s3361_s25, 4  ;;  %s42_s26 = int_to_ptr.vmem [resolvable:$true] %s41_s26 }
   0x9   :  { %44 = dma.hbm_to_vmem [thread:$0]  %s40_s24, 4096, %s42_s26, [#allocation8] }
   0xa   :  { %3354 = dma.done.wait [#allocation8], 4096 }
   0xb   :  { %3355 = vsyncadd [#allocation8], 4294963200  ;;  %v3031_v0 = vld [vmem:[#allocation4 + $0x78] sm:$0xff]  ;;  %v3030_v4 = vld [vmem:[#allocation4 + $0x70] sm:$0xff]  ;;  %s2301_s6 = sshll.u32 %s3427_s4, 4  ;;  %s3364_s7 = smov 8   ;;  %s2302_s6 = int_to_ptr.hbm [resolvable:$true] %s2301_s6 }
   0xc   :  { %v3010_v1 = vld [vmem:[#allocation4 + $0x38] sm:$0xff]  ;;  %262 = vmatpush.bf16.msra.mxu0 %v3031_v0  ;;  %v3009_v5 = vld [vmem:[#allocation4 + $0x30] sm:$0xff]  ;;  %v3029_v8 = vld [vmem:[#allocation4 + $0x68] sm:$0xff] }
   0xd   :  { %v3052_v2 = vld [vmem:[#allocation4 + $0xb8] sm:$0xff]  ;;  %462 = vmatpush.bf16.msra.mxu1 %v3010_v1  ;;  %v3051_v6 = vld [vmem:[#allocation4 + $0xb0] sm:$0xff]  ;;  %v3008_v9 = vld [vmem:[#allocation4 + $0x28] sm:$0xff] }
   0xe   :  { %v3073_v3 = vld [vmem:[#allocation4 + $0xf8] sm:$0xff]  ;;  %706 = vmatpush.bf16.msra.mxu2 %v3052_v2  ;;  %v3072_v7 = vld [vmem:[#allocation4 + $0xf0] sm:$0xff]  ;;  %v3050_v10 = vld [vmem:[#allocation4 + $0xa8] sm:$0xff] }
   0xf   :  { %976 = vmatpush.bf16.msra.mxu3 %v3073_v3  ;;  %v3071_v11 = vld [vmem:[#allocation4 + $0xe8] sm:$0xff]  ;;  %v3028_v12 = vld [vmem:[#allocation4 + $0x60] sm:$0xff]  ;;  %v3027_v16 = vld [vmem:[#allocation4 + $0x58] sm:$0xff] }
  0x10   :  { %263 = vmatpush.bf16.msra.mxu0 %v3030_v4  ;;  %v3007_v13 = vld [vmem:[#allocation4 + $0x20] sm:$0xff]  ;;  %v3006_v17 = vld [vmem:[#allocation4 + $0x18] sm:$0xff]  ;;  %v3026_v20 = vld [vmem:[#allocation4 + $0x50] sm:$0xff] }
  0x11   :  { %463 = vmatpush.bf16.msra.mxu1 %v3009_v5  ;;  %v3049_v14 = vld [vmem:[#allocation4 + $0xa0] sm:$0xff]  ;;  %v3048_v18 = vld [vmem:[#allocation4 + $0x98] sm:$0xff]  ;;  %v3005_v21 = vld [vmem:[#allocation4 + $0x10] sm:$0xff] }
  0x12   :  { %707 = vmatpush.bf16.msra.mxu2 %v3051_v6  ;;  %v3070_v15 = vld [vmem:[#allocation4 + $0xe0] sm:$0xff]  ;;  %v3069_v19 = vld [vmem:[#allocation4 + $0xd8] sm:$0xff]  ;;  %v3047_v22 = vld [vmem:[#allocation4 + $0x90] sm:$0xff] }
  0x13   :  { %977 = vmatpush.bf16.msra.mxu3 %v3072_v7  ;;  %v3068_v23 = vld [vmem:[#allocation4 + $0xd0] sm:$0xff]  ;;  %v3025_v24 = vld [vmem:[#allocation4 + $0x48] sm:$0xff]  ;;  %v3024_v28 = vld [vmem:[#allocation4 + $0x40] sm:$0xff] }
  0x14   :  { %264 = vmatpush.bf16.msra.mxu0 %v3029_v8  ;;  %v3004_v25 = vld [vmem:[#allocation4 + $0x8] sm:$0xff]  ;;  %v3003_v29 = vld [vmem:[#allocation4] sm:$0xff]  ;;  %v3136_v32 = vld [vmem:[#allocation4 + $0xb8] sm:$0xff] }
  0x15   :  { %464 = vmatpush.bf16.msra.mxu1 %v3008_v9  ;;  %v3046_v26 = vld [vmem:[#allocation4 + $0x88] sm:$0xff]  ;;  %v3045_v30 = vld [vmem:[#allocation4 + $0x80] sm:$0xff]  ;;  %v3157_v33 = vld [vmem:[#allocation4 + $0xf8] sm:$0xff] }
  0x16   :  { %708 = vmatpush.bf16.msra.mxu2 %v3050_v10  ;;  %v3067_v27 = vld [vmem:[#allocation4 + $0xc8] sm:$0xff]  ;;  %v3066_v31 = vld [vmem:[#allocation4 + $0xc0] sm:$0xff]  ;;  %v3032_v36 = vld [vmem:[#allocation2 + $0x10] sm:$0xff] }
  0x17   :  { %978 = vmatpush.bf16.msra.mxu3 %v3071_v11  ;;  %v3011_v34 = vld [vmem:[#allocation2 + $0x8] sm:$0xff]  ;;  %v2990_v35 = vld [vmem:[#allocation2] sm:$0xff]  ;;  %v3053_v37 = vld [vmem:[#allocation2 + $0x18] sm:$0xff] }
  0x18   :  { %265 = vmatpush.bf16.msra.mxu0 %v3028_v12  ;;  %v3115_v38 = vld [vmem:[#allocation4 + $0x78] sm:$0xff]  ;;  %v3135_v40 = vld [vmem:[#allocation4 + $0xb0] sm:$0xff]  ;;  %v2991_v45 = vld [vmem:[#allocation2 + $0x8] sm:$0xff] }
  0x19   :  { %465 = vmatpush.bf16.msra.mxu1 %v3007_v13  ;;  %v3094_v39 = vld [vmem:[#allocation4 + $0x38] sm:$0xff]  ;;  %v3156_v41 = vld [vmem:[#allocation4 + $0xf0] sm:$0xff]  ;;  %v3054_v47 = vld [vmem:[#allocation2 + $0x20] sm:$0xff] }
  0x1a   :  { %709 = vmatpush.bf16.msra.mxu2 %v3049_v14  ;;  %v3114_v42 = vld [vmem:[#allocation4 + $0x70] sm:$0xff]  ;;  %v3033_v46 = vld [vmem:[#allocation2 + $0x18] sm:$0xff]  ;;  %v3134_v48 = vld [vmem:[#allocation4 + $0xa8] sm:$0xff] }
  0x1b   :  { %979 = vmatpush.bf16.msra.mxu3 %v3070_v15  ;;  %v3093_v43 = vld [vmem:[#allocation4 + $0x30] sm:$0xff]  ;;  %v3155_v49 = vld [vmem:[#allocation4 + $0xe8] sm:$0xff]  ;;  %v3013_v52 = vld [vmem:[#allocation2 + $0x18] sm:$0xff] }
  0x1c   :  { %266 = vmatpush.bf16.msra.mxu0 %v3027_v16  ;;  %v3012_v44 = vld [vmem:[#allocation2 + $0x10] sm:$0xff]  ;;  %v3113_v50 = vld [vmem:[#allocation4 + $0x68] sm:$0xff]  ;;  %v3034_v54 = vld [vmem:[#allocation2 + $0x20] sm:$0xff] }
  0x1d   :  { %466 = vmatpush.bf16.msra.mxu1 %v3006_v17  ;;  %v3092_v51 = vld [vmem:[#allocation4 + $0x28] sm:$0xff]  ;;  %v2992_v53 = vld [vmem:[#allocation2 + $0x10] sm:$0xff]  ;;  %v3133_v56 = vld [vmem:[#allocation4 + $0xa0] sm:$0xff] }
  0x1e   :  { %710 = vmatpush.bf16.msra.mxu2 %v3048_v18  ;;  %v3055_v55 = vld [vmem:[#allocation2 + $0x28] sm:$0xff]  ;;  %v3014_v57 = vld [vmem:[#allocation2 + $0x20] sm:$0xff]  ;;  %v2993_v58 = vld [vmem:[#allocation2 + $0x18] sm:$0xff] }
  0x1f   :  { %980 = vmatpush.bf16.msra.mxu3 %v3069_v19  ;;  %v3035_v59 = vld [vmem:[#allocation2 + $0x28] sm:$0xff]  ;;  %v3056_v60 = vld [vmem:[#allocation2 + $0x30] sm:$0xff]  ;;  %v3154_v61 = vld [vmem:[#allocation4 + $0xe0] sm:$0xff] }
  0x20   :  { %267 = vmatpush.bf16.msra.mxu0 %v3026_v20  ;;  %v3112_v62 = vld [vmem:[#allocation4 + $0x60] sm:$0xff]  ;;  %v3015_v0 = vld [vmem:[#allocation2 + $0x28] sm:$0xff]  ;;  %v3036_v2 = vld [vmem:[#allocation2 + $0x30] sm:$0xff] }
  0x21   :  { %467 = vmatpush.bf16.msra.mxu1 %v3005_v21  ;;  %v3091_v63 = vld [vmem:[#allocation4 + $0x20] sm:$0xff]  ;;  %v3057_v3 = vld [vmem:[#allocation2 + $0x38] sm:$0xff]  ;;  %v3016_v8 = vld [vmem:[#allocation2 + $0x30] sm:$0xff] }
  0x22   :  { %711 = vmatpush.bf16.msra.mxu2 %v3047_v22  ;;  %v2994_v1 = vld [vmem:[#allocation2 + $0x20] sm:$0xff]  ;;  %v3132_v4 = vld [vmem:[#allocation4 + $0x98] sm:$0xff]  ;;  %v2995_v9 = vld [vmem:[#allocation2 + $0x28] sm:$0xff] }
  0x23   :  { %981 = vmatpush.bf16.msra.mxu3 %v3068_v23  ;;  %v3153_v5 = vld [vmem:[#allocation4 + $0xd8] sm:$0xff]  ;;  %v3058_v11 = vld [vmem:[#allocation2 + $0x40] sm:$0xff]  ;;  %v2996_v13 = vld [vmem:[#allocation2 + $0x30] sm:$0xff] }
  0x24   :  { %268 = vmatpush.bf16.msra.mxu0 %v3025_v24  ;;  %v3111_v6 = vld [vmem:[#allocation4 + $0x58] sm:$0xff]  ;;  %v3038_v14 = vld [vmem:[#allocation2 + $0x40] sm:$0xff]  ;;  %v3059_v15 = vld [vmem:[#allocation2 + $0x48] sm:$0xff] }
  0x25   :  { %468 = vmatpush.bf16.msra.mxu1 %v3004_v25  ;;  %v3090_v7 = vld [vmem:[#allocation4 + $0x18] sm:$0xff]  ;;  %v3131_v16 = vld [vmem:[#allocation4 + $0x90] sm:$0xff]  ;;  %v3018_v20 = vld [vmem:[#allocation2 + $0x40] sm:$0xff] }
  0x26   :  { %712 = vmatpush.bf16.msra.mxu2 %v3046_v26  ;;  %v3037_v10 = vld [vmem:[#allocation2 + $0x38] sm:$0xff]  ;;  %v3152_v17 = vld [vmem:[#allocation4 + $0xd0] sm:$0xff]  ;;  %v3039_v22 = vld [vmem:[#allocation2 + $0x48] sm:$0xff] }
  0x27   :  { %982 = vmatpush.bf16.msra.mxu3 %v3067_v27  ;;  %v3017_v12 = vld [vmem:[#allocation2 + $0x38] sm:$0xff]  ;;  %v3110_v18 = vld [vmem:[#allocation4 + $0x50] sm:$0xff]  ;;  %v3019_v24 = vld [vmem:[#allocation2 + $0x48] sm:$0xff] }
  0x28   :  { %269 = vmatpush.bf16.msra.mxu0 %v3024_v28  ;;  %v3089_v19 = vld [vmem:[#allocation4 + $0x10] sm:$0xff]  ;;  %v2997_v21 = vld [vmem:[#allocation2 + $0x38] sm:$0xff]  ;;  %v2998_v25 = vld [vmem:[#allocation2 + $0x40] sm:$0xff] }
  0x29   :  { %469 = vmatpush.bf16.msra.mxu1 %v3003_v29  ;;  %v3060_v23 = vld [vmem:[#allocation2 + $0x50] sm:$0xff]  ;;  %v3061_v29 = vld [vmem:[#allocation2 + $0x58] sm:$0xff] }
  0x2a   :  { %713 = vmatpush.bf16.msra.mxu2 %v3045_v30  ;;  %v3040_v28 = vld [vmem:[#allocation2 + $0x50] sm:$0xff] }
  0x2b   :  { %983 = vmatpush.bf16.msra.mxu3 %v3066_v31  ;;  %270 = vmatmul.bf16.vlgmr.msra.gmra.mxu0 %v3011_v34 }
  0x2c   :  { %470 = vmatmul.bf16.vlgmr.msra.gmra.mxu1 %v2990_v35  ;;  %1346 = vmatpush.bf16.msrb.mxu0 %v3115_v38  ;;  %v3130_v38 = vld [vmem:[#allocation4 + $0x88] sm:$0xff] }
  0x2d   :  { %714 = vmatmul.bf16.vlgmr.msra.gmra.mxu2 %v3032_v36  ;;  %1546 = vmatpush.bf16.msrb.mxu1 %v3094_v39  ;;  %v3151_v39 = vld [vmem:[#allocation4 + $0xc8] sm:$0xff] }
  0x2e   :  { %1791 = vmatpush.bf16.msrb.mxu2 %v3136_v32  ;;  %984 = vmatmul.bf16.vlgmr.msra.gmra.mxu3 %v3053_v37 }
  0x2f   :  { %2062 = vmatpush.bf16.msrb.mxu3 %v3157_v33 }
  0x30   :  { %1347 = vmatpush.bf16.msrb.mxu0 %v3114_v42 }
  0x31   :  { %1547 = vmatpush.bf16.msrb.mxu1 %v3093_v43 }
  0x32   :  { %1792 = vmatpush.bf16.msrb.mxu2 %v3135_v40  ;;  %v3109_v40 = vld [vmem:[#allocation4 + $0x48] sm:$0xff] }
  0x33   :  { %2063 = vmatpush.bf16.msrb.mxu3 %v3156_v41  ;;  %v3088_v41 = vld [vmem:[#allocation4 + $0x8] sm:$0xff] }
  0x34   :  { %1348 = vmatpush.bf16.msrb.mxu0 %v3113_v50  ;;  %v3062_v50 = vld [vmem:[#allocation2 + $0x60] sm:$0xff] }
  0x35   :  { %1548 = vmatpush.bf16.msrb.mxu1 %v3092_v51 }
  0x36   :  { %1793 = vmatpush.bf16.msrb.mxu2 %v3134_v48 }
  0x37   :  { %2064 = vmatpush.bf16.msrb.mxu3 %v3155_v49  ;;  %v3041_v49 = vld [vmem:[#allocation2 + $0x58] sm:$0xff] }
  0x38   :  { %1349 = vmatpush.bf16.msrb.mxu0 %v3112_v62  ;;  %v3021_v62 = vld [vmem:[#allocation2 + $0x58] sm:$0xff] }
  0x39   :  { %1549 = vmatpush.bf16.msrb.mxu1 %v3091_v63  ;;  %v3000_v63 = vld [vmem:[#allocation2 + $0x50] sm:$0xff] }
  0x3a   :  { %1794 = vmatpush.bf16.msrb.mxu2 %v3133_v56 }
  0x3b   :  { %275 = vmatmul.bf16.gmra.mxu0 %v3012_v44  ;;  %2065 = vmatpush.bf16.msrb.mxu3 %v3154_v61  ;;  %v3020_v44 = vld [vmem:[#allocation2 + $0x50] sm:$0xff] }
  0x3c   :  { %475 = vmatmul.bf16.gmra.mxu1 %v2991_v45  ;;  %1350 = vmatpush.bf16.msrb.mxu0 %v3111_v6  ;;  %v2999_v45 = vld [vmem:[#allocation2 + $0x48] sm:$0xff] }
  0x3d   :  { %719 = vmatmul.bf16.gmra.mxu2 %v3033_v46  ;;  %1550 = vmatpush.bf16.msrb.mxu1 %v3090_v7 }
  0x3e   :  { %989 = vmatmul.bf16.gmra.mxu3 %v3054_v47  ;;  %1795 = vmatpush.bf16.msrb.mxu2 %v3132_v4  ;;  %v3063_v4 = vld [vmem:[#allocation2 + $0x68] sm:$0xff] }
  0x3f   :  { %2066 = vmatpush.bf16.msrb.mxu3 %v3153_v5 }
  0x40   :  { %1351 = vmatpush.bf16.msrb.mxu0 %v3110_v18 }
  0x41   :  { %1551 = vmatpush.bf16.msrb.mxu1 %v3089_v19 }
  0x42   :  { %1796 = vmatpush.bf16.msrb.mxu2 %v3131_v16 }
  0x43   :  { %2067 = vmatpush.bf16.msrb.mxu3 %v3152_v17 }
  0x44   :  { %1352 = vmatpush.bf16.msrb.mxu0 %v3109_v40 }
  0x45   :  { %1552 = vmatpush.bf16.msrb.mxu1 %v3088_v41 }
  0x46   :  { %1797 = vmatpush.bf16.msrb.mxu2 %v3130_v38 }
  0x47   :  { %2068 = vmatpush.bf16.msrb.mxu3 %v3151_v39 }
  0x4b   :  { %280 = vmatmul.bf16.gmra.mxu0 %v3013_v52 }
  0x4c   :  { %480 = vmatmul.bf16.gmra.mxu1 %v2992_v53 }
  0x4d   :  { %724 = vmatmul.bf16.gmra.mxu2 %v3034_v54 }
  0x4e   :  { %994 = vmatmul.bf16.gmra.mxu3 %v3055_v55 }
  0x5b   :  { %285 = vmatmul.bf16.gmra.mxu0 %v3014_v57 }
  0x5c   :  { %485 = vmatmul.bf16.gmra.mxu1 %v2993_v58 }
  0x5d   :  { %729 = vmatmul.bf16.gmra.mxu2 %v3035_v59 }
  0x5e   :  { %999 = vmatmul.bf16.gmra.mxu3 %v3056_v60 }
  0x6b   :  { %290 = vmatmul.bf16.gmra.mxu0 %v3015_v0 }
  0x6c   :  { %490 = vmatmul.bf16.gmra.mxu1 %v2994_v1 }
  0x6d   :  { %734 = vmatmul.bf16.gmra.mxu2 %v3036_v2 }
  0x6e   :  { %1004 = vmatmul.bf16.gmra.mxu3 %v3057_v3  ;;  %v3042_v3 = vld [vmem:[#allocation2 + $0x60] sm:$0xff] }
  0x7b   :  { %295 = vmatmul.bf16.gmra.mxu0 %v3016_v8 }
  0x7c   :  { %495 = vmatmul.bf16.gmra.mxu1 %v2995_v9 }
  0x7d   :  { %739 = vmatmul.bf16.gmra.mxu2 %v3037_v10  ;;  %v3129_v10 = vld [vmem:[#allocation4 + $0x80] sm:$0xff] }
  0x7e   :  { %1009 = vmatmul.bf16.gmra.mxu3 %v3058_v11  ;;  %v3150_v11 = vld [vmem:[#allocation4 + $0xc0] sm:$0xff]  ;;  %1798 = vmatpush.bf16.msrb.mxu2 %v3129_v10 }
  0x7f   :  { %2069 = vmatpush.bf16.msrb.mxu3 %v3150_v11  ;;  %v3116_v11 = vld [vmem:[#allocation2 + $0x90] sm:$0xff] }
  0x8b   :  { %300 = vmatmul.bf16.gmra.mxu0 %v3017_v12  ;;  %v3108_v12 = vld [vmem:[#allocation4 + $0x40] sm:$0xff] }
  0x8c   :  { %500 = vmatmul.bf16.gmra.mxu1 %v2996_v13  ;;  %v3087_v13 = vld [vmem:[#allocation4] sm:$0xff]  ;;  %1353 = vmatpush.bf16.msrb.mxu0 %v3108_v12  ;;  %v3137_v12 = vld [vmem:[#allocation2 + $0x98] sm:$0xff] }
  0x8d   :  { %744 = vmatmul.bf16.gmra.mxu2 %v3038_v14  ;;  %1553 = vmatpush.bf16.msrb.mxu1 %v3087_v13 }
  0x8e   :  { %1014 = vmatmul.bf16.gmra.mxu3 %v3059_v15 }
  0x9b   :  { %305 = vmatmul.bf16.gmra.mxu0 %v3018_v20 }
  0x9c   :  { %505 = vmatmul.bf16.gmra.mxu1 %v2997_v21 }
  0x9d   :  { %749 = vmatmul.bf16.gmra.mxu2 %v3039_v22 }
  0x9e   :  { %1019 = vmatmul.bf16.gmra.mxu3 %v3060_v23 }
  0xa8   :  { %v271_v26 = vpop.f32.mrf.mxu0 }
  0xa9   :  { %v471_v27 = vpop.f32.mrf.mxu1 }
  0xaa   :  { %v472_v30 = vadd.f32 %v471_v27, %v271_v26  ;;  %v3022_v26 = vld [vmem:[#allocation2 + $0x60] sm:$0xff]  ;;  %v3001_v27 = vld [vmem:[#allocation2 + $0x58] sm:$0xff] }
  0xab   :  { %310 = vmatmul.bf16.gmra.mxu0 %v3019_v24 }
  0xac   :  { %510 = vmatmul.bf16.gmra.mxu1 %v2998_v25 }
  0xad   :  { %754 = vmatmul.bf16.gmra.mxu2 %v3040_v28 }
  0xae   :  { %1024 = vmatmul.bf16.gmra.mxu3 %v3061_v29 }
  0xb0   :  { %v715_v31 = vpop.f32.mrf.mxu2  ;;  %v273_v34 = vpop.f32.mrf.mxu0 }
  0xb1   :  { %v985_v32 = vpop.f32.mrf.mxu3  ;;  %v780_v33 = vadd.f32 %v715_v31, %v472_v30  ;;  %v473_v35 = vpop.f32.mrf.mxu1  ;;  %v3043_v31 = vld [vmem:[#allocation2 + $0x68] sm:$0xff] }
  0xb2   :  { %v474_v36 = vadd.f32 %v473_v35, %v273_v34 }
  0xb3   :  { %v1050_v37 = vadd.f32 %v985_v32, %v780_v33  ;;  %v3064_v32 = vld [vmem:[#allocation2 + $0x70] sm:$0xff] }
  0xb5   :  { %3166 = vtanh.f32 %v1050_v37 }
  0xb8   :  { %v717_v42 = vpop.f32.mrf.mxu2  ;;  %v276_v47 = vpop.f32.mrf.mxu0 }
  0xb9   :  { %v987_v43 = vpop.f32.mrf.mxu3  ;;  %v781_v46 = vadd.f32 %v717_v42, %v474_v36  ;;  %v476_v48 = vpop.f32.mrf.mxu1 }
  0xba   :  { %v477_v51 = vadd.f32 %v476_v48, %v276_v47  ;;  %v3023_v48 = vld [vmem:[#allocation2 + $0x68] sm:$0xff] }
  0xbb   :  { %v1051_v52 = vadd.f32 %v987_v43, %v781_v46  ;;  %315 = vmatmul.bf16.gmra.mxu0 %v3020_v44  ;;  %v3167_v5 = vpop.eup %3166 }
  0xbc   :  { %515 = vmatmul.bf16.gmra.mxu1 %v2999_v45 }
  0xbd   :  { %759 = vmatmul.bf16.gmra.mxu2 %v3041_v49  ;;  %v3002_v49 = vld [vmem:[#allocation2 + $0x60] sm:$0xff] }
  0xbe   :  { %1029 = vmatmul.bf16.gmra.mxu3 %v3062_v50 }
  0xc0   :  { %v720_v53 = vpop.f32.mrf.mxu2  ;;  %v278_v56 = vpop.f32.mrf.mxu0 }
  0xc1   :  { %v990_v54 = vpop.f32.mrf.mxu3  ;;  %v782_v55 = vadd.f32 %v720_v53, %v477_v51  ;;  %v478_v57 = vpop.f32.mrf.mxu1  ;;  %v3044_v53 = vld [vmem:[#allocation2 + $0x70] sm:$0xff] }
  0xc2   :  { %v479_v58 = vadd.f32 %v478_v57, %v278_v56 }
  0xc3   :  { %v1052_v59 = vadd.f32 %v990_v54, %v782_v55  ;;  %v3065_v54 = vld [vmem:[#allocation2 + $0x78] sm:$0xff] }
  0xc5   :  { %3168 = vtanh.f32 %v1052_v59 }
  0xc6   :  { %3170 = vtanh.f32 %v1051_v52 }
  0xc8   :  { %v722_v60 = vpop.f32.mrf.mxu2  ;;  %v281_v1 = vpop.f32.mrf.mxu0 }
  0xc9   :  { %v992_v61 = vpop.f32.mrf.mxu3  ;;  %v783_v0 = vadd.f32 %v722_v60, %v479_v58  ;;  %v481_v2 = vpop.f32.mrf.mxu1 }
  0xca   :  { %v482_v6 = vadd.f32 %v481_v2, %v281_v1 }
  0xcb   :  { %v3169_v7 = vpop.eup %3168  ;;  %v1053_v8 = vadd.f32 %v992_v61, %v783_v0  ;;  %320 = vmatmul.bf16.gmra.mxu0 %v3021_v62 }
  0xcc   :  { %v1102_v9 = vadd.f32 %v3169_v7, %v3167_v5  ;;  %520 = vmatmul.bf16.gmra.mxu1 %v3000_v63  ;;  %v3171_v19 = vpop.eup %3170  ;;  %v3074_v7 = vld [vmem:[#allocation2 + $0x80] sm:$0xff] }
  0xcd   :  { %3172 = vtanh.f32 %v1053_v8  ;;  %764 = vmatmul.bf16.gmra.mxu2 %v3042_v3 }
  0xce   :  { %1034 = vmatmul.bf16.gmra.mxu3 %v3063_v4 }
  0xd0   :  { %v725_v14 = vpop.f32.mrf.mxu2  ;;  %v283_v17 = vpop.f32.mrf.mxu0 }
  0xd1   :  { %v995_v15 = vpop.f32.mrf.mxu3  ;;  %v784_v16 = vadd.f32 %v725_v14, %v482_v6  ;;  %v483_v18 = vpop.f32.mrf.mxu1  ;;  %v3095_v6 = vld [vmem:[#allocation2 + $0x88] sm:$0xff] }
  0xd2   :  { %v484_v20 = vadd.f32 %v483_v18, %v283_v17 }
  0xd3   :  { %v3173_v21 = vpop.eup %3172  ;;  %v1054_v22 = vadd.f32 %v995_v15, %v784_v16 }
  0xd4   :  { %v1114_v23 = vadd.f32 %v3173_v21, %v3171_v19 }
  0xd5   :  { %3174 = vtanh.f32 %v1054_v22 }
  0xd8   :  { %v727_v24 = vpop.f32.mrf.mxu2  ;;  %v286_v29 = vpop.f32.mrf.mxu0 }
  0xd9   :  { %v997_v25 = vpop.f32.mrf.mxu3  ;;  %v785_v28 = vadd.f32 %v727_v24, %v484_v20  ;;  %v486_v30 = vpop.f32.mrf.mxu1 }
  0xda   :  { %v487_v33 = vadd.f32 %v486_v30, %v286_v29  ;;  %v3075_v29 = vld [vmem:[#allocation2 + $0x88] sm:$0xff] }
  0xdb   :  { %v3175_v34 = vpop.eup %3174  ;;  %v1055_v35 = vadd.f32 %v997_v25, %v785_v28  ;;  %325 = vmatmul.bf16.gmra.mxu0 %v3022_v26  ;;  %v3096_v28 = vld [vmem:[#allocation2 + $0x90] sm:$0xff] }
  0xdc   :  { %v1103_v36 = vadd.f32 %v3175_v34, %v1102_v9  ;;  %525 = vmatmul.bf16.gmra.mxu1 %v3001_v27  ;;  %v3138_v34 = vld [vmem:[#allocation2 + $0xa0] sm:$0xff] }
  0xdd   :  { %3176 = vtanh.f32 %v1055_v35  ;;  %769 = vmatmul.bf16.gmra.mxu2 %v3043_v31 }
  0xde   :  { %1039 = vmatmul.bf16.gmra.mxu3 %v3064_v32 }
  0xe0   :  { %v730_v37 = vpop.f32.mrf.mxu2  ;;  %v288_v40 = vpop.f32.mrf.mxu0 }
  0xe1   :  { %v1000_v38 = vpop.f32.mrf.mxu3  ;;  %v786_v39 = vadd.f32 %v730_v37, %v487_v33  ;;  %v488_v41 = vpop.f32.mrf.mxu1  ;;  %v3117_v33 = vld [vmem:[#allocation2 + $0x98] sm:$0xff] }
  0xe2   :  { %v489_v42 = vadd.f32 %v488_v41, %v288_v40 }
  0xe3   :  { %v3177_v43 = vpop.eup %3176  ;;  %v1056_v44 = vadd.f32 %v1000_v38, %v786_v39 }
  0xe4   :  { %v1115_v45 = vadd.f32 %v3177_v43, %v1114_v23 }
  0xe5   :  { %3178 = vtanh.f32 %v1056_v44 }
  0xe8   :  { %v732_v46 = vpop.f32.mrf.mxu2  ;;  %v291_v51 = vpop.f32.mrf.mxu0 }
  0xe9   :  { %v1002_v47 = vpop.f32.mrf.mxu3  ;;  %v787_v50 = vadd.f32 %v732_v46, %v489_v42  ;;  %v491_v52 = vpop.f32.mrf.mxu1 }
  0xea   :  { %v492_v55 = vadd.f32 %v491_v52, %v291_v51  ;;  %v3076_v51 = vld [vmem:[#allocation2 + $0x90] sm:$0xff] }
  0xeb   :  { %v3179_v56 = vpop.eup %3178  ;;  %v1057_v57 = vadd.f32 %v1002_v47, %v787_v50  ;;  %330 = vmatmul.bf16.gmra.mxu0 %v3023_v48  ;;  %v3097_v50 = vld [vmem:[#allocation2 + $0x98] sm:$0xff] }
  0xec   :  { %v1104_v58 = vadd.f32 %v3179_v56, %v1103_v36  ;;  %530 = vmatmul.bf16.gmra.mxu1 %v3002_v49  ;;  %v3139_v56 = vld [vmem:[#allocation2 + $0xa8] sm:$0xff] }
  0xed   :  { %3180 = vtanh.f32 %v1057_v57  ;;  %774 = vmatmul.bf16.gmra.mxu2 %v3044_v53 }
  0xee   :  { %1044 = vmatmul.bf16.gmra.mxu3 %v3065_v54 }
  0xf0   :  { %v735_v59 = vpop.f32.mrf.mxu2  ;;  %v293_v62 = vpop.f32.mrf.mxu0 }
  0xf1   :  { %v1005_v60 = vpop.f32.mrf.mxu3  ;;  %v788_v61 = vadd.f32 %v735_v59, %v492_v55  ;;  %v493_v63 = vpop.f32.mrf.mxu1  ;;  %v3118_v55 = vld [vmem:[#allocation2 + $0xa0] sm:$0xff] }
  0xf2   :  { %v494_v0 = vadd.f32 %v493_v63, %v293_v62 }
  0xf3   :  { %v3181_v1 = vpop.eup %3180  ;;  %v1058_v2 = vadd.f32 %v1005_v60, %v788_v61 }
  0xf4   :  { %v1116_v3 = vadd.f32 %v3181_v1, %v1115_v45 }
  0xf5   :  { %3182 = vtanh.f32 %v1058_v2 }
  0xf8   :  { %v737_v4 = vpop.f32.mrf.mxu2  ;;  %v296_v9 = vpop.f32.mrf.mxu0 }
  0xf9   :  { %v1007_v5 = vpop.f32.mrf.mxu3  ;;  %v789_v8 = vadd.f32 %v737_v4, %v494_v0  ;;  %v496_v10 = vpop.f32.mrf.mxu1 }
  0xfa   :  { %v497_v13 = vadd.f32 %v496_v10, %v296_v9  ;;  %v3077_v9 = vld [vmem:[#allocation2 + $0x98] sm:$0xff] }
  0xfb   :  { %v3183_v14 = vpop.eup %3182  ;;  %v1059_v15 = vadd.f32 %v1007_v5, %v789_v8  ;;  %1354 = vmatmul.bf16.vlgmr.msrb.gmra.mxu0 %v3095_v6  ;;  %v3098_v8 = vld [vmem:[#allocation2 + $0xa0] sm:$0xff] }
  0xfc   :  { %v1105_v16 = vadd.f32 %v3183_v14, %v1104_v58  ;;  %1554 = vmatmul.bf16.vlgmr.msrb.gmra.mxu1 %v3074_v7  ;;  %v3140_v14 = vld [vmem:[#allocation2 + $0xb0] sm:$0xff] }
  0xfd   :  { %3184 = vtanh.f32 %v1059_v15  ;;  %1799 = vmatmul.bf16.vlgmr.msrb.gmra.mxu2 %v3116_v11 }
  0xfe   :  { %2070 = vmatmul.bf16.vlgmr.msrb.gmra.mxu3 %v3137_v12 }
 0x100   :  { %v740_v17 = vpop.f32.mrf.mxu2  ;;  %v298_v20 = vpop.f32.mrf.mxu0 }
 0x101   :  { %v1010_v18 = vpop.f32.mrf.mxu3  ;;  %v790_v19 = vadd.f32 %v740_v17, %v497_v13  ;;  %v498_v21 = vpop.f32.mrf.mxu1  ;;  %v3119_v13 = vld [vmem:[#allocation2 + $0xa8] sm:$0xff] }
 0x102   :  { %v499_v22 = vadd.f32 %v498_v21, %v298_v20 }
 0x103   :  { %v3185_v23 = vpop.eup %3184  ;;  %v1060_v24 = vadd.f32 %v1010_v18, %v790_v19 }
 0x104   :  { %v1117_v25 = vadd.f32 %v3185_v23, %v1116_v3 }
 0x105   :  { %3186 = vtanh.f32 %v1060_v24 }
 0x108   :  { %v742_v26 = vpop.f32.mrf.mxu2  ;;  %v301_v31 = vpop.f32.mrf.mxu0 }
 0x109   :  { %v1012_v27 = vpop.f32.mrf.mxu3  ;;  %v791_v30 = vadd.f32 %v742_v26, %v499_v22  ;;  %v501_v32 = vpop.f32.mrf.mxu1 }
 0x10a   :  { %v502_v35 = vadd.f32 %v501_v32, %v301_v31  ;;  %v3078_v31 = vld [vmem:[#allocation2 + $0xa0] sm:$0xff] }
 0x10b   :  { %v3187_v36 = vpop.eup %3186  ;;  %v1061_v37 = vadd.f32 %v1012_v27, %v791_v30  ;;  %1359 = vmatmul.bf16.gmra.mxu0 %v3096_v28  ;;  %v3099_v30 = vld [vmem:[#allocation2 + $0xa8] sm:$0xff] }
 0x10c   :  { %v1106_v38 = vadd.f32 %v3187_v36, %v1105_v16  ;;  %1559 = vmatmul.bf16.gmra.mxu1 %v3075_v29  ;;  %v3141_v36 = vld [vmem:[#allocation2 + $0xb8] sm:$0xff] }
 0x10d   :  { %3188 = vtanh.f32 %v1061_v37  ;;  %1804 = vmatmul.bf16.gmra.mxu2 %v3117_v33 }
 0x10e   :  { %2075 = vmatmul.bf16.gmra.mxu3 %v3138_v34 }
 0x110   :  { %v745_v39 = vpop.f32.mrf.mxu2  ;;  %v303_v42 = vpop.f32.mrf.mxu0 }
 0x111   :  { %v1015_v40 = vpop.f32.mrf.mxu3  ;;  %v792_v41 = vadd.f32 %v745_v39, %v502_v35  ;;  %v503_v43 = vpop.f32.mrf.mxu1  ;;  %v3120_v35 = vld [vmem:[#allocation2 + $0xb0] sm:$0xff] }
 0x112   :  { %v504_v44 = vadd.f32 %v503_v43, %v303_v42 }
 0x113   :  { %v3189_v45 = vpop.eup %3188  ;;  %v1062_v46 = vadd.f32 %v1015_v40, %v792_v41 }
 0x114   :  { %v1118_v47 = vadd.f32 %v3189_v45, %v1117_v25 }
 0x115   :  { %3190 = vtanh.f32 %v1062_v46 }
 0x118   :  { %v747_v48 = vpop.f32.mrf.mxu2  ;;  %v306_v53 = vpop.f32.mrf.mxu0 }
 0x119   :  { %v1017_v49 = vpop.f32.mrf.mxu3  ;;  %v793_v52 = vadd.f32 %v747_v48, %v504_v44  ;;  %v506_v54 = vpop.f32.mrf.mxu1 }
 0x11a   :  { %v507_v57 = vadd.f32 %v506_v54, %v306_v53  ;;  %v3079_v53 = vld [vmem:[#allocation2 + $0xa8] sm:$0xff] }
 0x11b   :  { %v3191_v58 = vpop.eup %3190  ;;  %v1063_v59 = vadd.f32 %v1017_v49, %v793_v52  ;;  %1364 = vmatmul.bf16.gmra.mxu0 %v3097_v50  ;;  %v3100_v52 = vld [vmem:[#allocation2 + $0xb0] sm:$0xff] }
 0x11c   :  { %v1107_v60 = vadd.f32 %v3191_v58, %v1106_v38  ;;  %1564 = vmatmul.bf16.gmra.mxu1 %v3076_v51  ;;  %v3142_v58 = vld [vmem:[#allocation2 + $0xc0] sm:$0xff] }
 0x11d   :  { %3192 = vtanh.f32 %v1063_v59  ;;  %1809 = vmatmul.bf16.gmra.mxu2 %v3118_v55 }
 0x11e   :  { %2080 = vmatmul.bf16.gmra.mxu3 %v3139_v56 }
 0x120   :  { %v750_v61 = vpop.f32.mrf.mxu2  ;;  %v308_v0 = vpop.f32.mrf.mxu0 }
 0x121   :  { %v1020_v62 = vpop.f32.mrf.mxu3  ;;  %v794_v63 = vadd.f32 %v750_v61, %v507_v57  ;;  %v508_v1 = vpop.f32.mrf.mxu1  ;;  %v3121_v57 = vld [vmem:[#allocation2 + $0xb8] sm:$0xff] }
 0x122   :  { %v509_v2 = vadd.f32 %v508_v1, %v308_v0 }
 0x123   :  { %v3193_v3 = vpop.eup %3192  ;;  %v1064_v4 = vadd.f32 %v1020_v62, %v794_v63 }
 0x124   :  { %v1119_v5 = vadd.f32 %v3193_v3, %v1118_v47 }
 0x125   :  { %3194 = vtanh.f32 %v1064_v4 }
 0x128   :  { %v752_v6 = vpop.f32.mrf.mxu2  ;;  %v311_v11 = vpop.f32.mrf.mxu0 }
 0x129   :  { %v1022_v7 = vpop.f32.mrf.mxu3  ;;  %v795_v10 = vadd.f32 %v752_v6, %v509_v2  ;;  %v511_v12 = vpop.f32.mrf.mxu1 }
 0x12a   :  { %v512_v15 = vadd.f32 %v511_v12, %v311_v11  ;;  %v3080_v11 = vld [vmem:[#allocation2 + $0xb0] sm:$0xff] }
 0x12b   :  { %v3195_v16 = vpop.eup %3194  ;;  %v1065_v17 = vadd.f32 %v1022_v7, %v795_v10  ;;  %1369 = vmatmul.bf16.gmra.mxu0 %v3098_v8  ;;  %v3101_v10 = vld [vmem:[#allocation2 + $0xb8] sm:$0xff] }
 0x12c   :  { %v1108_v18 = vadd.f32 %v3195_v16, %v1107_v60  ;;  %1569 = vmatmul.bf16.gmra.mxu1 %v3077_v9  ;;  %v3143_v16 = vld [vmem:[#allocation2 + $0xc8] sm:$0xff] }
 0x12d   :  { %3196 = vtanh.f32 %v1065_v17  ;;  %1814 = vmatmul.bf16.gmra.mxu2 %v3119_v13 }
 0x12e   :  { %2085 = vmatmul.bf16.gmra.mxu3 %v3140_v14 }
 0x130   :  { %v755_v19 = vpop.f32.mrf.mxu2  ;;  %v313_v22 = vpop.f32.mrf.mxu0 }
 0x131   :  { %v1025_v20 = vpop.f32.mrf.mxu3  ;;  %v796_v21 = vadd.f32 %v755_v19, %v512_v15  ;;  %v513_v23 = vpop.f32.mrf.mxu1  ;;  %v3122_v15 = vld [vmem:[#allocation2 + $0xc0] sm:$0xff] }
 0x132   :  { %v514_v24 = vadd.f32 %v513_v23, %v313_v22 }
 0x133   :  { %v3197_v25 = vpop.eup %3196  ;;  %v1066_v26 = vadd.f32 %v1025_v20, %v796_v21 }
 0x134   :  { %v1120_v27 = vadd.f32 %v3197_v25, %v1119_v5 }
 0x135   :  { %3198 = vtanh.f32 %v1066_v26 }
 0x138   :  { %v757_v28 = vpop.f32.mrf.mxu2  ;;  %v316_v33 = vpop.f32.mrf.mxu0 }
 0x139   :  { %v1027_v29 = vpop.f32.mrf.mxu3  ;;  %v797_v32 = vadd.f32 %v757_v28, %v514_v24  ;;  %v516_v34 = vpop.f32.mrf.mxu1 }
 0x13a   :  { %v517_v37 = vadd.f32 %v516_v34, %v316_v33  ;;  %v3081_v33 = vld [vmem:[#allocation2 + $0xb8] sm:$0xff] }
 0x13b   :  { %v3199_v38 = vpop.eup %3198  ;;  %v1067_v39 = vadd.f32 %v1027_v29, %v797_v32  ;;  %1374 = vmatmul.bf16.gmra.mxu0 %v3099_v30  ;;  %v3102_v32 = vld [vmem:[#allocation2 + $0xc0] sm:$0xff] }
 0x13c   :  { %v1109_v40 = vadd.f32 %v3199_v38, %v1108_v18  ;;  %1574 = vmatmul.bf16.gmra.mxu1 %v3078_v31  ;;  %v3144_v38 = vld [vmem:[#allocation2 + $0xd0] sm:$0xff] }
 0x13d   :  { %3200 = vtanh.f32 %v1067_v39  ;;  %1819 = vmatmul.bf16.gmra.mxu2 %v3120_v35 }
 0x13e   :  { %2090 = vmatmul.bf16.gmra.mxu3 %v3141_v36 }
 0x140   :  { %v760_v41 = vpop.f32.mrf.mxu2  ;;  %v318_v44 = vpop.f32.mrf.mxu0 }
 0x141   :  { %v1030_v42 = vpop.f32.mrf.mxu3  ;;  %v798_v43 = vadd.f32 %v760_v41, %v517_v37  ;;  %v518_v45 = vpop.f32.mrf.mxu1  ;;  %v3123_v37 = vld [vmem:[#allocation2 + $0xc8] sm:$0xff] }
 0x142   :  { %v519_v46 = vadd.f32 %v518_v45, %v318_v44 }
 0x143   :  { %v3201_v47 = vpop.eup %3200  ;;  %v1068_v48 = vadd.f32 %v1030_v42, %v798_v43 }
 0x144   :  { %v1121_v49 = vadd.f32 %v3201_v47, %v1120_v27 }
 0x145   :  { %3202 = vtanh.f32 %v1068_v48 }
 0x148   :  { %v762_v50 = vpop.f32.mrf.mxu2  ;;  %v321_v55 = vpop.f32.mrf.mxu0 }
 0x149   :  { %v1032_v51 = vpop.f32.mrf.mxu3  ;;  %v799_v54 = vadd.f32 %v762_v50, %v519_v46  ;;  %v521_v56 = vpop.f32.mrf.mxu1 }
 0x14a   :  { %v522_v59 = vadd.f32 %v521_v56, %v321_v55  ;;  %v3082_v55 = vld [vmem:[#allocation2 + $0xc0] sm:$0xff] }
 0x14b   :  { %v3203_v60 = vpop.eup %3202  ;;  %v1069_v61 = vadd.f32 %v1032_v51, %v799_v54  ;;  %1379 = vmatmul.bf16.gmra.mxu0 %v3100_v52  ;;  %v3103_v54 = vld [vmem:[#allocation2 + $0xc8] sm:$0xff] }
 0x14c   :  { %v1110_v62 = vadd.f32 %v3203_v60, %v1109_v40  ;;  %1579 = vmatmul.bf16.gmra.mxu1 %v3079_v53  ;;  %v3145_v60 = vld [vmem:[#allocation2 + $0xd8] sm:$0xff] }
 0x14d   :  { %3204 = vtanh.f32 %v1069_v61  ;;  %1824 = vmatmul.bf16.gmra.mxu2 %v3121_v57 }
 0x14e   :  { %2095 = vmatmul.bf16.gmra.mxu3 %v3142_v58 }
 0x150   :  { %v765_v63 = vpop.f32.mrf.mxu2  ;;  %v323_v2 = vpop.f32.mrf.mxu0 }
 0x151   :  { %v1035_v0 = vpop.f32.mrf.mxu3  ;;  %v800_v1 = vadd.f32 %v765_v63, %v522_v59  ;;  %v523_v3 = vpop.f32.mrf.mxu1  ;;  %v3124_v59 = vld [vmem:[#allocation2 + $0xd0] sm:$0xff] }
 0x152   :  { %v524_v4 = vadd.f32 %v523_v3, %v323_v2 }
 0x153   :  { %v3205_v5 = vpop.eup %3204  ;;  %v1070_v6 = vadd.f32 %v1035_v0, %v800_v1 }
 0x154   :  { %v1122_v7 = vadd.f32 %v3205_v5, %v1121_v49 }
 0x155   :  { %3206 = vtanh.f32 %v1070_v6 }
 0x158   :  { %v767_v8 = vpop.f32.mrf.mxu2  ;;  %v326_v13 = vpop.f32.mrf.mxu0 }
 0x159   :  { %v1037_v9 = vpop.f32.mrf.mxu3  ;;  %v801_v12 = vadd.f32 %v767_v8, %v524_v4  ;;  %v526_v14 = vpop.f32.mrf.mxu1 }
 0x15a   :  { %v527_v17 = vadd.f32 %v526_v14, %v326_v13  ;;  %v3104_v13 = vld [vmem:[#allocation2 + $0xd0] sm:$0xff]  ;;  %v3083_v14 = vld [vmem:[#allocation2 + $0xc8] sm:$0xff] }
 0x15b   :  { %v3207_v18 = vpop.eup %3206  ;;  %v1071_v19 = vadd.f32 %v1037_v9, %v801_v12  ;;  %1384 = vmatmul.bf16.gmra.mxu0 %v3101_v10 }
 0x15c   :  { %v1111_v20 = vadd.f32 %v3207_v18, %v1110_v62  ;;  %1584 = vmatmul.bf16.gmra.mxu1 %v3080_v11  ;;  %v3125_v18 = vld [vmem:[#allocation2 + $0xd8] sm:$0xff] }
 0x15d   :  { %3208 = vtanh.f32 %v1071_v19  ;;  %1829 = vmatmul.bf16.gmra.mxu2 %v3122_v15  ;;  %v3146_v19 = vld [vmem:[#allocation2 + $0xe0] sm:$0xff] }
 0x15e   :  { %2100 = vmatmul.bf16.gmra.mxu3 %v3143_v16 }
 0x160   :  { %v770_v21 = vpop.f32.mrf.mxu2  ;;  %v328_v24 = vpop.f32.mrf.mxu0 }
 0x161   :  { %v1040_v22 = vpop.f32.mrf.mxu3  ;;  %v802_v23 = vadd.f32 %v770_v21, %v527_v17  ;;  %v528_v25 = vpop.f32.mrf.mxu1 }
 0x162   :  { %v529_v26 = vadd.f32 %v528_v25, %v328_v24 }
 0x163   :  { %v3209_v27 = vpop.eup %3208  ;;  %v1072_v28 = vadd.f32 %v1040_v22, %v802_v23 }
 0x164   :  { %v1123_v29 = vadd.f32 %v3209_v27, %v1122_v7 }
 0x165   :  { %3210 = vtanh.f32 %v1072_v28 }
 0x168   :  { %v772_v30 = vpop.f32.mrf.mxu2  ;;  %v331_v35 = vpop.f32.mrf.mxu0 }
 0x169   :  { %v1042_v31 = vpop.f32.mrf.mxu3  ;;  %v803_v34 = vadd.f32 %v772_v30, %v529_v26  ;;  %v531_v36 = vpop.f32.mrf.mxu1 }
 0x16a   :  { %v532_v39 = vadd.f32 %v531_v36, %v331_v35  ;;  %v3126_v36 = vld [vmem:[#allocation2 + $0xe0] sm:$0xff] }
 0x16b   :  { %v3211_v40 = vpop.eup %3210  ;;  %v1073_v41 = vadd.f32 %v1042_v31, %v803_v34  ;;  %1389 = vmatmul.bf16.gmra.mxu0 %v3102_v32  ;;  %v3105_v31 = vld [vmem:[#allocation2 + $0xd8] sm:$0xff]  ;;  %v3084_v32 = vld [vmem:[#allocation2 + $0xd0] sm:$0xff] }
 0x16c   :  { %v1112_v42 = vadd.f32 %v3211_v40, %v1111_v20  ;;  %1589 = vmatmul.bf16.gmra.mxu1 %v3081_v33 }
 0x16d   :  { %3212 = vtanh.f32 %v1073_v41  ;;  %1834 = vmatmul.bf16.gmra.mxu2 %v3123_v37  ;;  %v3147_v37 = vld [vmem:[#allocation2 + $0xe8] sm:$0xff] }
 0x16e   :  { %2105 = vmatmul.bf16.gmra.mxu3 %v3144_v38 }
 0x170   :  { %v775_v43 = vpop.f32.mrf.mxu2  ;;  %v333_v46 = vpop.f32.mrf.mxu0 }
 0x171   :  { %v1045_v44 = vpop.f32.mrf.mxu3  ;;  %v804_v45 = vadd.f32 %v775_v43, %v532_v39  ;;  %v533_v47 = vpop.f32.mrf.mxu1 }
 0x172   :  { %v534_v48 = vadd.f32 %v533_v47, %v333_v46 }
 0x173   :  { %v3213_v49 = vpop.eup %3212  ;;  %v1074_v50 = vadd.f32 %v1045_v44, %v804_v45 }
 0x174   :  { %v1124_v51 = vadd.f32 %v3213_v49, %v1123_v29 }
 0x175   :  { %3214 = vtanh.f32 %v1074_v50 }
 0x178   :  { %v777_v52 = vpop.f32.mrf.mxu2  ;;  %v1355_v57 = vpop.f32.mrf.mxu0 }
 0x179   :  { %v1047_v53 = vpop.f32.mrf.mxu3  ;;  %v805_v56 = vadd.f32 %v777_v52, %v534_v48  ;;  %v1555_v58 = vpop.f32.mrf.mxu1 }
 0x17a   :  { %v1556_v61 = vadd.f32 %v1555_v58, %v1355_v57 }
 0x17b   :  { %v3215_v62 = vpop.eup %3214  ;;  %v1075_v63 = vadd.f32 %v1047_v53, %v805_v56  ;;  %1394 = vmatmul.bf16.gmra.mxu0 %v3103_v54  ;;  %v3085_v56 = vld [vmem:[#allocation2 + $0xd8] sm:$0xff] }
 0x17c   :  { %v3396_v0 = vadd.f32 %v3215_v62, %v1112_v42  ;;  %1594 = vmatmul.bf16.gmra.mxu1 %v3082_v55  ;;  %v3106_v55 = vld [vmem:[#allocation2 + $0xe0] sm:$0xff] }
 0x17d   :  { %3216 = vtanh.f32 %v1075_v63  ;;  %1839 = vmatmul.bf16.gmra.mxu2 %v3124_v59 }
 0x17e   :  { %2110 = vmatmul.bf16.gmra.mxu3 %v3145_v60  ;;  %v3127_v60 = vld [vmem:[#allocation2 + $0xe8] sm:$0xff] }
 0x180   :  { %v1800_v1 = vpop.f32.mrf.mxu2  ;;  %v1357_v4 = vpop.f32.mrf.mxu0 }
 0x181   :  { %v2071_v2 = vpop.f32.mrf.mxu3  ;;  %v1865_v3 = vadd.f32 %v1800_v1, %v1556_v61  ;;  %v1557_v5 = vpop.f32.mrf.mxu1  ;;  %v3148_v61 = vld [vmem:[#allocation2 + $0xf0] sm:$0xff] }
 0x182   :  { %v1558_v6 = vadd.f32 %v1557_v5, %v1357_v4 }
 0x183   :  { %v3217_v7 = vpop.eup %3216  ;;  %v2136_v8 = vadd.f32 %v2071_v2, %v1865_v3 }
 0x184   :  { %v3398_v9 = vadd.f32 %v3217_v7, %v1124_v51 }
 0x185   :  { %3218 = vtanh.f32 %v2136_v8 }
 0x186   :  { %v3402_v10 = vadd.f32 %v3398_v9, %v3396_v0 }
 0x188   :  { %v1802_v11 = vpop.f32.mrf.mxu2  ;;  %v1360_v16 = vpop.f32.mrf.mxu0 }
 0x189   :  { %v2073_v12 = vpop.f32.mrf.mxu3  ;;  %v1866_v15 = vadd.f32 %v1802_v11, %v1558_v6  ;;  %v1560_v17 = vpop.f32.mrf.mxu1 }
 0x18a   :  { %v1561_v20 = vadd.f32 %v1560_v17, %v1360_v16  ;;  %v3107_v16 = vld [vmem:[#allocation2 + $0xe8] sm:$0xff]  ;;  %v3086_v17 = vld [vmem:[#allocation2 + $0xe0] sm:$0xff] }
 0x18b   :  { %v2137_v21 = vadd.f32 %v2073_v12, %v1866_v15  ;;  %1399 = vmatmul.bf16.gmra.mxu0 %v3104_v13  ;;  %v3219_v38 = vpop.eup %3218 }
 0x18c   :  { %1599 = vmatmul.bf16.gmra.mxu1 %v3083_v14 }
 0x18d   :  { %1844 = vmatmul.bf16.gmra.mxu2 %v3125_v18 }
 0x18e   :  { %2115 = vmatmul.bf16.gmra.mxu3 %v3146_v19 }
 0x190   :  { %v1805_v22 = vpop.f32.mrf.mxu2  ;;  %v1362_v25 = vpop.f32.mrf.mxu0 }
 0x191   :  { %v2076_v23 = vpop.f32.mrf.mxu3  ;;  %v1867_v24 = vadd.f32 %v1805_v22, %v1561_v20  ;;  %v1562_v26 = vpop.f32.mrf.mxu1  ;;  %v3149_v22 = vld [vmem:[#allocation2 + $0xf8] sm:$0xff] }
 0x192   :  { %v1563_v27 = vadd.f32 %v1562_v26, %v1362_v25 }
 0x193   :  { %v2138_v28 = vadd.f32 %v2076_v23, %v1867_v24 }
 0x195   :  { %3220 = vtanh.f32 %v2138_v28 }
 0x196   :  { %3222 = vtanh.f32 %v2137_v21  ;;  %v3128_v21 = vld [vmem:[#allocation2 + $0xf0] sm:$0xff] }
 0x198   :  { %v1807_v29 = vpop.f32.mrf.mxu2  ;;  %v1365_v34 = vpop.f32.mrf.mxu0 }
 0x199   :  { %v2078_v30 = vpop.f32.mrf.mxu3  ;;  %v1868_v33 = vadd.f32 %v1807_v29, %v1563_v27  ;;  %v1565_v35 = vpop.f32.mrf.mxu1 }
 0x19a   :  { %v1566_v39 = vadd.f32 %v1565_v35, %v1365_v34 }
 0x19b   :  { %v3221_v40 = vpop.eup %3220  ;;  %v2139_v41 = vadd.f32 %v2078_v30, %v1868_v33  ;;  %1404 = vmatmul.bf16.gmra.mxu0 %v3105_v31 }
 0x19c   :  { %v2188_v42 = vadd.f32 %v3221_v40, %v3219_v38  ;;  %1604 = vmatmul.bf16.gmra.mxu1 %v3084_v32  ;;  %v3223_v48 = vpop.eup %3222 }
 0x19d   :  { %3224 = vtanh.f32 %v2139_v41  ;;  %1849 = vmatmul.bf16.gmra.mxu2 %v3126_v36 }
 0x19e   :  { %2120 = vmatmul.bf16.gmra.mxu3 %v3147_v37 }
 0x1a0   :  { %v1810_v43 = vpop.f32.mrf.mxu2  ;;  %v1367_v46 = vpop.f32.mrf.mxu0 }
 0x1a1   :  { %v2081_v44 = vpop.f32.mrf.mxu3  ;;  %v1869_v45 = vadd.f32 %v1810_v43, %v1566_v39  ;;  %v1567_v47 = vpop.f32.mrf.mxu1 }
 0x1a2   :  { %v1568_v49 = vadd.f32 %v1567_v47, %v1367_v46 }
 0x1a3   :  { %v3225_v50 = vpop.eup %3224  ;;  %v2140_v51 = vadd.f32 %v2081_v44, %v1869_v45 }
 0x1a4   :  { %v2200_v52 = vadd.f32 %v3225_v50, %v3223_v48 }
 0x1a5   :  { %3226 = vtanh.f32 %v2140_v51 }
 0x1a8   :  { %v1812_v53 = vpop.f32.mrf.mxu2  ;;  %v1370_v58 = vpop.f32.mrf.mxu0 }
 0x1a9   :  { %v2083_v54 = vpop.f32.mrf.mxu3  ;;  %v1870_v57 = vadd.f32 %v1812_v53, %v1568_v49  ;;  %v1570_v59 = vpop.f32.mrf.mxu1 }
 0x1aa   :  { %v1571_v62 = vadd.f32 %v1570_v59, %v1370_v58 }
 0x1ab   :  { %v3227_v63 = vpop.eup %3226  ;;  %v2141_v1 = vadd.f32 %v2083_v54, %v1870_v57  ;;  %1409 = vmatmul.bf16.gmra.mxu0 %v3106_v55 }
 0x1ac   :  { %v2189_v2 = vadd.f32 %v3227_v63, %v2188_v42  ;;  %1609 = vmatmul.bf16.gmra.mxu1 %v3085_v56 }
 0x1ad   :  { %3228 = vtanh.f32 %v2141_v1  ;;  %1854 = vmatmul.bf16.gmra.mxu2 %v3127_v60 }
 0x1ae   :  { %2125 = vmatmul.bf16.gmra.mxu3 %v3148_v61 }
 0x1b0   :  { %v1815_v3 = vpop.f32.mrf.mxu2  ;;  %v1372_v6 = vpop.f32.mrf.mxu0 }
 0x1b1   :  { %v2086_v4 = vpop.f32.mrf.mxu3  ;;  %v1871_v5 = vadd.f32 %v1815_v3, %v1571_v62  ;;  %v1572_v7 = vpop.f32.mrf.mxu1 }
 0x1b2   :  { %v1573_v8 = vadd.f32 %v1572_v7, %v1372_v6 }
 0x1b3   :  { %v3229_v11 = vpop.eup %3228  ;;  %v2142_v12 = vadd.f32 %v2086_v4, %v1871_v5 }
 0x1b4   :  { %v2201_v13 = vadd.f32 %v3229_v11, %v2200_v52 }
 0x1b5   :  { %3230 = vtanh.f32 %v2142_v12 }
 0x1b8   :  { %v1817_v14 = vpop.f32.mrf.mxu2  ;;  %v1375_v19 = vpop.f32.mrf.mxu0 }
 0x1b9   :  { %v2088_v15 = vpop.f32.mrf.mxu3  ;;  %v1872_v18 = vadd.f32 %v1817_v14, %v1573_v8  ;;  %v1575_v20 = vpop.f32.mrf.mxu1 }
 0x1ba   :  { %v1576_v23 = vadd.f32 %v1575_v20, %v1375_v19 }
 0x1bb   :  { %v3231_v24 = vpop.eup %3230  ;;  %v2143_v25 = vadd.f32 %v2088_v15, %v1872_v18  ;;  %1414 = vmatmul.bf16.gmra.mxu0 %v3107_v16 }
 0x1bc   :  { %v2190_v26 = vadd.f32 %v3231_v24, %v2189_v2  ;;  %1614 = vmatmul.bf16.gmra.mxu1 %v3086_v17 }
 0x1bd   :  { %3232 = vtanh.f32 %v2143_v25  ;;  %1859 = vmatmul.bf16.gmra.mxu2 %v3128_v21 }
 0x1be   :  { %2130 = vmatmul.bf16.gmra.mxu3 %v3149_v22 }
 0x1c0   :  { %v1820_v27 = vpop.f32.mrf.mxu2  ;;  %v1377_v30 = vpop.f32.mrf.mxu0 }
 0x1c1   :  { %v2091_v28 = vpop.f32.mrf.mxu3  ;;  %v1873_v29 = vadd.f32 %v1820_v27, %v1576_v23  ;;  %v1577_v31 = vpop.f32.mrf.mxu1 }
 0x1c2   :  { %v1578_v32 = vadd.f32 %v1577_v31, %v1377_v30 }
 0x1c3   :  { %v3233_v33 = vpop.eup %3232  ;;  %v2144_v34 = vadd.f32 %v2091_v28, %v1873_v29 }
 0x1c4   :  { %v2202_v35 = vadd.f32 %v3233_v33, %v2201_v13 }
 0x1c5   :  { %3234 = vtanh.f32 %v2144_v34 }
 0x1c8   :  { %v1822_v36 = vpop.f32.mrf.mxu2  ;;  %v1380_v39 = vpop.f32.mrf.mxu0 }
 0x1c9   :  { %v2093_v37 = vpop.f32.mrf.mxu3  ;;  %v1874_v38 = vadd.f32 %v1822_v36, %v1578_v32  ;;  %v1580_v40 = vpop.f32.mrf.mxu1 }
 0x1ca   :  { %v1581_v41 = vadd.f32 %v1580_v40, %v1380_v39 }
 0x1cb   :  { %v3235_v42 = vpop.eup %3234  ;;  %v2145_v43 = vadd.f32 %v2093_v37, %v1874_v38 }
 0x1cc   :  { %v2191_v44 = vadd.f32 %v3235_v42, %v2190_v26 }
 0x1cd   :  { %3236 = vtanh.f32 %v2145_v43 }
 0x1d0   :  { %v1825_v45 = vpop.f32.mrf.mxu2  ;;  %v1382_v48 = vpop.f32.mrf.mxu0 }
 0x1d1   :  { %v2096_v46 = vpop.f32.mrf.mxu3  ;;  %v1875_v47 = vadd.f32 %v1825_v45, %v1581_v41  ;;  %v1582_v49 = vpop.f32.mrf.mxu1 }
 0x1d2   :  { %v1583_v50 = vadd.f32 %v1582_v49, %v1382_v48 }
 0x1d3   :  { %v3237_v51 = vpop.eup %3236  ;;  %v2146_v52 = vadd.f32 %v2096_v46, %v1875_v47 }
 0x1d4   :  { %v2203_v53 = vadd.f32 %v3237_v51, %v2202_v35 }
 0x1d5   :  { %3238 = vtanh.f32 %v2146_v52 }
 0x1d8   :  { %v1827_v54 = vpop.f32.mrf.mxu2  ;;  %v1385_v57 = vpop.f32.mrf.mxu0 }
 0x1d9   :  { %v2098_v55 = vpop.f32.mrf.mxu3  ;;  %v1876_v56 = vadd.f32 %v1827_v54, %v1583_v50  ;;  %v1585_v58 = vpop.f32.mrf.mxu1 }
 0x1da   :  { %v1586_v59 = vadd.f32 %v1585_v58, %v1385_v57 }
 0x1db   :  { %v3239_v60 = vpop.eup %3238  ;;  %v2147_v61 = vadd.f32 %v2098_v55, %v1876_v56 }
 0x1dc   :  { %v2192_v62 = vadd.f32 %v3239_v60, %v2191_v44 }
 0x1dd   :  { %3240 = vtanh.f32 %v2147_v61 }
 0x1e0   :  { %v1830_v63 = vpop.f32.mrf.mxu2  ;;  %v1387_v3 = vpop.f32.mrf.mxu0 }
 0x1e1   :  { %v2101_v1 = vpop.f32.mrf.mxu3  ;;  %v1877_v2 = vadd.f32 %v1830_v63, %v1586_v59  ;;  %v1587_v4 = vpop.f32.mrf.mxu1 }
 0x1e2   :  { %v1588_v5 = vadd.f32 %v1587_v4, %v1387_v3 }
 0x1e3   :  { %v3241_v6 = vpop.eup %3240  ;;  %v2148_v7 = vadd.f32 %v2101_v1, %v1877_v2 }
 0x1e4   :  { %v2204_v8 = vadd.f32 %v3241_v6, %v2203_v53 }
 0x1e5   :  { %3242 = vtanh.f32 %v2148_v7 }
 0x1e8   :  { %v1832_v11 = vpop.f32.mrf.mxu2  ;;  %v1390_v14 = vpop.f32.mrf.mxu0 }
 0x1e9   :  { %v2103_v12 = vpop.f32.mrf.mxu3  ;;  %v1878_v13 = vadd.f32 %v1832_v11, %v1588_v5  ;;  %v1590_v15 = vpop.f32.mrf.mxu1 }
 0x1ea   :  { %v1591_v16 = vadd.f32 %v1590_v15, %v1390_v14 }
 0x1eb   :  { %v3243_v17 = vpop.eup %3242  ;;  %v2149_v18 = vadd.f32 %v2103_v12, %v1878_v13 }
 0x1ec   :  { %v2193_v19 = vadd.f32 %v3243_v17, %v2192_v62 }
 0x1ed   :  { %3244 = vtanh.f32 %v2149_v18 }
 0x1f0   :  { %v1835_v20 = vpop.f32.mrf.mxu2  ;;  %v1392_v23 = vpop.f32.mrf.mxu0 }
 0x1f1   :  { %v2106_v21 = vpop.f32.mrf.mxu3  ;;  %v1879_v22 = vadd.f32 %v1835_v20, %v1591_v16  ;;  %v1592_v24 = vpop.f32.mrf.mxu1 }
 0x1f2   :  { %v1593_v25 = vadd.f32 %v1592_v24, %v1392_v23 }
 0x1f3   :  { %v3245_v26 = vpop.eup %3244  ;;  %v2150_v27 = vadd.f32 %v2106_v21, %v1879_v22 }
 0x1f4   :  { %v2205_v28 = vadd.f32 %v3245_v26, %v2204_v8 }
 0x1f5   :  { %3246 = vtanh.f32 %v2150_v27 }
 0x1f8   :  { %v1837_v29 = vpop.f32.mrf.mxu2  ;;  %v1395_v32 = vpop.f32.mrf.mxu0 }
 0x1f9   :  { %v2108_v30 = vpop.f32.mrf.mxu3  ;;  %v1880_v31 = vadd.f32 %v1837_v29, %v1593_v25  ;;  %v1595_v33 = vpop.f32.mrf.mxu1 }
 0x1fa   :  { %v1596_v34 = vadd.f32 %v1595_v33, %v1395_v32 }
 0x1fb   :  { %v3247_v35 = vpop.eup %3246  ;;  %v2151_v36 = vadd.f32 %v2108_v30, %v1880_v31 }
 0x1fc   :  { %v2194_v37 = vadd.f32 %v3247_v35, %v2193_v19 }
 0x1fd   :  { %3248 = vtanh.f32 %v2151_v36 }
 0x200   :  { %v1840_v38 = vpop.f32.mrf.mxu2  ;;  %v1397_v41 = vpop.f32.mrf.mxu0 }
 0x201   :  { %v2111_v39 = vpop.f32.mrf.mxu3  ;;  %v1881_v40 = vadd.f32 %v1840_v38, %v1596_v34  ;;  %v1597_v42 = vpop.f32.mrf.mxu1 }
 0x202   :  { %v1598_v14 = vadd.f32 %v1597_v42, %v1397_v41 }
 0x203   :  { %v3249_v43 = vpop.eup %3248  ;;  %v2152_v44 = vadd.f32 %v2111_v39, %v1881_v40 }
 0x204   :  { %v3404_v45 = vadd.f32 %v3249_v43, %v2205_v28 }
 0x205   :  { %3250 = vtanh.f32 %v2152_v44 }
 0x208   :  { %v1842_v46 = vpop.f32.mrf.mxu2  ;;  %v1400_v48 = vpop.f32.mrf.mxu0 }
 0x209   :  { %v2113_v47 = vpop.f32.mrf.mxu3  ;;  %v1600_v49 = vpop.f32.mrf.mxu1  ;;  %v1882_v18 = vadd.f32 %v1842_v46, %v1598_v14 }
 0x20a   :  { %v1601_v11 = vadd.f32 %v1600_v49, %v1400_v48 }
 0x20b   :  { %v3251_v50 = vpop.eup %3250  ;;  %v2153_v25 = vadd.f32 %v2113_v47, %v1882_v18 }
 0x20c   :  { %v3406_v51 = vadd.f32 %v3251_v50, %v2194_v37 }
 0x20d   :  { %3252 = vtanh.f32 %v2153_v25 }
 0x210   :  { %v1845_v52 = vpop.f32.mrf.mxu2  ;;  %v1402_v54 = vpop.f32.mrf.mxu0 }
 0x211   :  { %v2116_v53 = vpop.f32.mrf.mxu3  ;;  %v1602_v55 = vpop.f32.mrf.mxu1  ;;  %v1883_v20 = vadd.f32 %v1845_v52, %v1601_v11 }
 0x212   :  { %v1603_v19 = vadd.f32 %v1602_v55, %v1402_v54 }
 0x213   :  { %v2154_v29 = vadd.f32 %v2116_v53, %v1883_v20  ;;  %v3253_v46 = vpop.eup %3252 }
 0x214   :  { %v2207_v54 = vadd.f32 %v3253_v46, %v3404_v45 }
 0x215   :  { %3254 = vtanh.f32 %v2154_v29 }
 0x218   :  { %v1847_v56 = vpop.f32.mrf.mxu2  ;;  %v1405_v58 = vpop.f32.mrf.mxu0 }
 0x219   :  { %v2118_v57 = vpop.f32.mrf.mxu3  ;;  %v1605_v59 = vpop.f32.mrf.mxu1  ;;  %v1884_v22 = vadd.f32 %v1847_v56, %v1603_v19 }
 0x21a   :  { %v1606_v15 = vadd.f32 %v1605_v59, %v1405_v58 }
 0x21b   :  { %v2155_v33 = vadd.f32 %v2118_v57, %v1884_v22  ;;  %v3255_v48 = vpop.eup %3254  ;;  %v2222_v57 = vrot.slane %v3402_v10, 4 }
 0x21c   :  { %v2196_v58 = vadd.f32 %v3255_v48, %v3406_v51 }
 0x21d   :  { %3256 = vtanh.f32 %v2155_v33 }
 0x220   :  { %v1850_v60 = vpop.f32.mrf.mxu2  ;;  %v1407_v62 = vpop.f32.mrf.mxu0 }
 0x221   :  { %v2121_v61 = vpop.f32.mrf.mxu3  ;;  %v1607_v63 = vpop.f32.mrf.mxu1  ;;  %v1885_v24 = vadd.f32 %v1850_v60, %v1606_v15 }
 0x222   :  { %v1608_v23 = vadd.f32 %v1607_v63, %v1407_v62 }
 0x223   :  { %v2156_v35 = vadd.f32 %v2121_v61, %v1885_v24  ;;  %v3257_v50 = vpop.eup %3256 }
 0x224   :  { %v2208_v59 = vadd.f32 %v3257_v50, %v2207_v54  ;;  %v3165_v54 = vld [vmem:[%s3426_s3] ss:$0 sm:$0xff]  ;;  %s3363_s3 = smov 128  }
 0x225   :  { %3258 = vtanh.f32 %v2156_v35 }
 0x228   :  { %v1852_v1 = vpop.f32.mrf.mxu2  ;;  %v1410_v3 = vpop.f32.mrf.mxu0 }
 0x229   :  { %v2123_v2 = vpop.f32.mrf.mxu3  ;;  %v1610_v4 = vpop.f32.mrf.mxu1  ;;  %v1886_v26 = vadd.f32 %v1852_v1, %v1608_v23  ;;  %v2223_v1 = vadd.f32 %v2222_v57, %v3402_v10 }
 0x22a   :  { %v1611_v21 = vadd.f32 %v1610_v4, %v1410_v3 }
 0x22b   :  { %v2157_v36 = vadd.f32 %v2123_v2, %v1886_v26  ;;  %v3259_v53 = vpop.eup %3258  ;;  %v2224_v45 = vrot.slane %v2223_v1, 2 }
 0x22c   :  { %v2197_v61 = vadd.f32 %v3259_v53, %v2196_v58 }
 0x22d   :  { %3260 = vtanh.f32 %v2157_v36  ;;  %v2225_v11 = vadd.f32 %v2224_v45, %v2223_v1 }
 0x22f   :  { %v2226_v14 = vrot.slane %v2225_v11, 1 }
 0x230   :  { %v1855_v5 = vpop.f32.mrf.mxu2  ;;  %v1412_v7 = vpop.f32.mrf.mxu0 }
 0x231   :  { %v2126_v6 = vpop.f32.mrf.mxu3  ;;  %v1612_v8 = vpop.f32.mrf.mxu1  ;;  %v1887_v30 = vadd.f32 %v1855_v5, %v1611_v21 }
 0x232   :  { %v1613_v27 = vadd.f32 %v1612_v8, %v1412_v7 }
 0x233   :  { %v2158_v38 = vadd.f32 %v2126_v6, %v1887_v30  ;;  %v3261_v55 = vpop.eup %3260 }
 0x234   :  { %v2209_v62 = vadd.f32 %v3261_v55, %v2208_v59 }
 0x235   :  { %3262 = vtanh.f32 %v2158_v38 }
 0x238   :  { %v1857_v12 = vpop.f32.mrf.mxu2  ;;  %v1415_v16 = vpop.f32.mrf.mxu0 }
 0x239   :  { %v2128_v13 = vpop.f32.mrf.mxu3  ;;  %v1615_v17 = vpop.f32.mrf.mxu1  ;;  %v1888_v34 = vadd.f32 %v1857_v12, %v1613_v27 }
 0x23a   :  { %v1616_v28 = vadd.f32 %v1615_v17, %v1415_v16  ;;  %v2227_v16 = vadd.f32 %v2226_v14, %v2225_v11 }
 0x23b   :  { %v2159_v41 = vadd.f32 %v2128_v13, %v1888_v34  ;;  %v3263_v56 = vpop.eup %3262 }
 0x23c   :  { %v2198_v2 = vadd.f32 %v3263_v56, %v2197_v61 }
 0x23d   :  { %3264 = vtanh.f32 %v2159_v41 }
 0x240   :  { %v1860_v31 = vpop.f32.mrf.mxu2  ;;  %v1417_v39 = vpop.f32.mrf.mxu0 }
 0x241   :  { %v2131_v32 = vpop.f32.mrf.mxu3  ;;  %v1889_v37 = vadd.f32 %v1860_v31, %v1616_v28  ;;  %v1617_v40 = vpop.f32.mrf.mxu1 }
 0x242   :  { %v1618_v43 = vadd.f32 %v1617_v40, %v1417_v39 }
 0x243   :  { %v2160_v42 = vadd.f32 %v2131_v32, %v1889_v37  ;;  %v3265_v60 = vpop.eup %3264 }
 0x244   :  { %v2210_v3 = vadd.f32 %v3265_v60, %v2209_v62 }
 0x245   :  { %3266 = vtanh.f32 %v2160_v42 }
 0x248   :  { %v1862_v44 = vpop.f32.mrf.mxu2 }
 0x249   :  { %v1890_v47 = vadd.f32 %v1862_v44, %v1618_v43  ;;  %v2133_v49 = vpop.f32.mrf.mxu3 }
 0x24b   :  { %v2161_v52 = vadd.f32 %v2133_v49, %v1890_v47  ;;  %v3267_v63 = vpop.eup %3266  ;;  %v2272_v49 = vld [vmem:[%s3425_s2] sm:$0x1]  ;;  %s3362_s2 = smov [#allocation7]  }
 0x24c   :  { %v2199_v5 = vadd.f32 %v3267_v63, %v2198_v2  ;;  %s2299_s29 = sshll.u32 %s3362_s2, 4  ;;  %s2300_s29 = int_to_ptr.vmem [resolvable:$true] %s2299_s29 }
 0x24d   :  { %3268 = vtanh.f32 %v2161_v52 }
 0x253   :  { %v3269_v4 = vpop.eup %3268 }
 0x254   :  { %v2211_v6 = vadd.f32 %v3269_v4, %v2210_v3 }
 0x256   :  { %v2228_v7 = vadd.f32 %v2211_v6, %v2199_v5 }
 0x258   :  { %v2229_v8 = vrot.slane %v2228_v7, 4 }
 0x25a   :  { %v2230_v12 = vadd.f32 %v2229_v8, %v2228_v7 }
 0x25c   :  { %v2231_v13 = vrot.slane %v2230_v12, 2 }
 0x25e   :  { %v2232_v51 = vadd.f32 %v2231_v13, %v2230_v12 }
 0x260   :  { %v2233_v15 = vrot.slane %v2232_v51, 1 }
 0x262   :  { %v2234_v17 = vadd.f32 %v2233_v15, %v2232_v51 }
 0x264   :  { %v2235_v18 = vadd.f32 %v2234_v17, %v2227_v16 }
 0x266   :  { %v2236_v19 = vmul.f32 0.03125, %v2235_v18 }
 0x268   :  { %v2237_v10 = vsub.f32 %v3396_v0, %v2236_v19  ;;  %v2238_v20 = vsub.f32 %v3398_v9, %v2236_v19  ;;  %v2239_v21 = vsub.f32 %v2199_v5, %v2236_v19  ;;  %v2240_v22 = vsub.f32 %v2211_v6, %v2236_v19 }
 0x26a   :  { %v2241_v23 = vmul.f32 %v2237_v10, %v2237_v10  ;;  %v2242_v24 = vmul.f32 %v2238_v20, %v2238_v20  ;;  %v2243_v25 = vmul.f32 %v2239_v21, %v2239_v21  ;;  %v2244_v26 = vmul.f32 %v2240_v22, %v2240_v22 }
 0x26c   :  { %v2245_v27 = vadd.f32 %v2242_v24, %v2241_v23  ;;  %v2252_v28 = vadd.f32 %v2244_v26, %v2243_v25 }
 0x26e   :  { %v2246_v29 = vrot.slane %v2245_v27, 4  ;;  %v2253_v30 = vrot.slane %v2252_v28, 4 }
 0x270   :  { %v2247_v31 = vadd.f32 %v2246_v29, %v2245_v27  ;;  %v2254_v32 = vadd.f32 %v2253_v30, %v2252_v28 }
 0x272   :  { %v2248_v33 = vrot.slane %v2247_v31, 2  ;;  %v2255_v34 = vrot.slane %v2254_v32, 2 }
 0x274   :  { %v2249_v35 = vadd.f32 %v2248_v33, %v2247_v31  ;;  %v2256_v36 = vadd.f32 %v2255_v34, %v2254_v32 }
 0x276   :  { %v2250_v37 = vrot.slane %v2249_v35, 1  ;;  %v2257_v0 = vrot.slane %v2256_v36, 1 }
 0x278   :  { %v2251_v38 = vadd.f32 %v2250_v37, %v2249_v35  ;;  %v2258_v9 = vadd.f32 %v2257_v0, %v2256_v36 }
 0x27a   :  { %v2259_v39 = vadd.f32 %v2258_v9, %v2251_v38 }
 0x27c   :  { %v2260_v40 = vmul.f32 0.03125, %v2259_v39 }
 0x27e   :  { %v2261_v41 = vadd.f32 1e-05, %v2260_v40 }
 0x280   :  { %3270 = vrsqrt.f32 %v2261_v41  ;;  %vm2268_vm1 = vweird.f32 %v2261_v41 }
 0x286   :  { %v3271_v42 = vpop.eup %3270 }
 0x287   :  { %v2263_v43 = vmul.f32 %v3271_v42, %v2261_v41  ;;  %vm2269_vm0 = vweird.f32 %v3271_v42 }
 0x288   :  { %vm2270_vm2 = vmor %vm2268_vm1, %vm2269_vm0 }
 0x289   :  { %v2264_v44 = vmul.f32 %v3271_v42, %v2263_v43 }
 0x28b   :  { %v2265_v46 = vmul.f32 0.5, %v2264_v44 }
 0x28d   :  { %v2266_v47 = vsub.f32 1.5, %v2265_v46 }
 0x28f   :  { %v2267_v48 = vmul.f32 %v3271_v42, %v2266_v47 }
 0x291   :  { %v2271_v50 = vsel %vm2270_vm2, %v3271_v42, %v2267_v48 }
 0x292   :  { %v2273_v52 = vmul.f32 %v2272_v49, %v2271_v50 }
 0x294   :  { %v2274_v53 = vperm.slane %v2273_v52, 0 }
 0x296   :  { %v2278_v55 = vmul.f32 %v2274_v53, %v2240_v22  ;;  %v2275_v56 = vmul.f32 %v2274_v53, %v2237_v10  ;;  %v2276_v57 = vmul.f32 %v2274_v53, %v2238_v20  ;;  %v2277_v58 = vmul.f32 %v2274_v53, %v2239_v21 }
 0x298   :  { %v2286_v59 = vadd.f32 %v3165_v54, %v2278_v55  ;;  %v2283_v60 = vadd.f32 %v3165_v54, %v2275_v56  ;;  %v2284_v61 = vadd.f32 %v3165_v54, %v2276_v57  ;;  %v2285_v62 = vadd.f32 %v3165_v54, %v2277_v58 }
 0x29a   :  { %3272 = vtanh.f32 %v2286_v59 }
 0x29b   :  { %3274 = vtanh.f32 %v2283_v60 }
 0x29c   :  { %3276 = vtanh.f32 %v2284_v61 }
 0x29d   :  { %3278 = vtanh.f32 %v2285_v62 }
 0x2a0   :  { %v3273_v63 = vpop.eup %3272 }
 0x2a1   :  { %v3275_v1 = vpop.eup %3274  ;;  %2294 = vst [vmem:[#allocation7 + $0x18] sm:$0xff] %v3273_v63 }
 0x2a2   :  { %v3277_v2 = vpop.eup %3276  ;;  %2291 = vst [vmem:[#allocation7] sm:$0xff] %v3275_v1 }
 0x2a3   :  { %v3279_v3 = vpop.eup %3278  ;;  %2292 = vst [vmem:[#allocation7 + $0x8] sm:$0xff] %v3277_v2 }
 0x2a4   :  { %2293 = vst [vmem:[#allocation7 + $0x10] sm:$0xff] %v3279_v3 }
 0x2a5   :  { %2307 = dma.vmem_to_hbm [thread:$0]  %s2300_s29, 512, %s2302_s6, [#allocation6], %s3363_s3, %s3363_s3, %s3364_s7  }
 0x2a6   :  { %3356 = dma.done.wait [#allocation6], 512  }
 0x2a7   :  { %3357 = vsyncadd [#allocation6], 4294966784 }
 0x2a8   :  { %2312 = vsyncpa [#allocation5], 1 }
 0x2a9   :  { %2313 = vsyncpa [#allocation6], 1 }

</bundles_post_ra>
